<compile_context>
chip_gen: v7x
topology: tpu7x:2x2x1
jax: 0.10.0
libtpu: 0.0.40
codegen_flags: <defaults>
</compile_context>

<pallas_src>
import jax
import jax.numpy as jnp
from jax.experimental import pallas as pl
from jax.experimental.pallas import tpu as pltpu


# ---------------------------------------------------------------------------
# Small helpers
# ---------------------------------------------------------------------------
def _round_up(x, k):
    return ((x + k - 1) // k) * k


def _m_tiles(m):
    """Pick the M tile: one big block for small M, >=2 parallel steps for big M
    (v7x has 2 TensorCores). Always a multiple of 8; M is padded to grid*tm."""
    if m >= 2048:
        tm = 1024
    elif m >= 256:
        tm = _round_up((m + 1) // 2, 8)       # ~half of M -> 2 grid steps
    else:
        tm = _round_up(m, 8)                  # single full-M block
    grid_m = -(-m // tm)                      # cdiv
    return tm, grid_m, grid_m * tm


def _fold_bn(conv_w, conv_b, gamma, beta, mean, var, eps=1e-5):
    """Fold eval-mode BatchNorm3d into the conv weight/bias.

    Returns (w2d, shift): w2d is [27*Cin, Cout], flattened in (kd, kh, kw, Cin)
    order (matches the channels-last im2col), with the BN scale multiplied into
    its columns; shift = beta + (conv_b - mean) * scale.
    """
    cout, cin = conv_w.shape[:2]
    scale = gamma / jnp.sqrt(var + eps)
    shift = beta + (conv_b - mean) * scale
    w2d = jnp.transpose(conv_w, (2, 3, 4, 1, 0)).reshape(27 * cin, cout)
    return w2d * scale[None, :], shift


def _im2col_3x3x3_s2_cl(a):
    """Channels-last im2col for Conv3d(k=3, s=2, p=1).

    a: [N, D, H, W, C] -> patches [N*Do*Ho*Wo, 27*C], flattened (kd, kh, kw, C)
    so it lines up with _fold_bn's weight flattening — no transposes needed.
    """
    # TODO(synk): build this 27-tap gather inside the kernel from a
    # VMEM-resident padded input (strided pl.ds reads) to avoid materializing
    # the patch matrix in HBM at all.
    n, d, h, w, c = a.shape
    do, ho, wo = (d + 1) // 2, (h + 1) // 2, (w + 1) // 2
    ap = jnp.pad(a, ((0, 0), (1, 1), (1, 1), (1, 1), (0, 0)))
    taps = []
    for kd in range(3):
        for kh in range(3):
            for kw in range(3):
                taps.append(ap[:, kd:kd + 2 * do:2, kh:kh + 2 * ho:2,
                               kw:kw + 2 * wo:2, :])
    patches = jnp.stack(taps, axis=-2)                     # [N,Do,Ho,Wo,27,C]
    return patches.reshape(n * do * ho * wo, 27 * c), (n, do, ho, wo)


# ---------------------------------------------------------------------------
# Fused GEMM + folded-BN shift + ReLU Pallas kernel (conv1..conv3)
# ---------------------------------------------------------------------------
def _gemm_bias_relu_kernel(p_ref, w_ref, shift_ref, o_ref):
    acc = jnp.dot(p_ref[...], w_ref[...], preferred_element_type=jnp.float32)
    o_ref[...] = jnp.maximum(acc + shift_ref[...], 0.0).astype(o_ref.dtype)


def _gemm_bias_relu(patches, w, shift, *, tm, grid_m):
    """relu(patches @ w + shift); patches [M,K] bf16, w [K,N] bf16, shift [1,N] f32."""
    m, k = patches.shape
    _, n = w.shape
    assert m == tm * grid_m
    return pl.pallas_call(
        _gemm_bias_relu_kernel,
        out_shape=jax.ShapeDtypeStruct((m, n), jnp.bfloat16),
        grid_spec=pltpu.PrefetchScalarGridSpec(
            num_scalar_prefetch=0,
            grid=(grid_m,),
            in_specs=[
                pl.BlockSpec((tm, k), lambda i: (i, 0)),   # patch rows (tiled over M)
                pl.BlockSpec((k, n), lambda i: (0, 0)),    # scale-folded weight (resident)
                pl.BlockSpec((1, n), lambda i: (0, 0)),    # folded bias / BN shift
            ],
            out_specs=pl.BlockSpec((tm, n), lambda i: (i, 0)),
        ),
        compiler_params=pltpu.CompilerParams(
            dimension_semantics=("parallel",)),
    )(patches, w, shift)


def conv3d_bn_relu(a, conv_w, conv_b, gamma, beta, mean, var):
    """Conv3d(k=3,s=2,p=1) + BatchNorm3d(eval) + ReLU; channels-last in/out (bf16)."""
    cout = conv_w.shape[0]
    w2d, shift = _fold_bn(conv_w, conv_b, gamma, beta, mean, var)
    # Lane-dense output stores: pad Cout to a multiple of 128.
    n_pad = _round_up(cout, 128)
    if n_pad != cout:
        w2d = jnp.pad(w2d, ((0, 0), (0, n_pad - cout)))
        shift = jnp.pad(shift, (0, n_pad - cout))

    patches, (n, do, ho, wo) = _im2col_3x3x3_s2_cl(a)
    m = patches.shape[0]
    tm, grid_m, m_pad = _m_tiles(m)
    if m_pad != m:
        patches = jnp.pad(patches, ((0, m_pad - m), (0, 0)))

    out = _gemm_bias_relu(patches.astype(jnp.bfloat16),
                          w2d.astype(jnp.bfloat16),
                          shift.reshape(1, n_pad).astype(jnp.float32),
                          tm=tm, grid_m=grid_m)
    # The slice/reshape fuses into the next layer's im2col gather in XLA.
    return out[:m, :cout].reshape(n, do, ho, wo, cout)


# ---------------------------------------------------------------------------
# Fused tail: conv4 + BN + ReLU + AdaptiveAvgPool3d((1,1,1)) + FC1 + ReLU + FC2
# ---------------------------------------------------------------------------
def _tail_kernel(p4_ref, w4_ref, shift4_ref, pool_ref, w1_ref, b1_ref,
                 w2_ref, b2_ref, o_ref):
    # conv4 (as an im2col GEMM) + folded BN + ReLU; f32 accumulate/epilogue.
    x4 = jnp.dot(p4_ref[...], w4_ref[...], preferred_element_type=jnp.float32)
    x4 = jnp.maximum(x4 + shift4_ref[...], 0.0)            # [BT*S4, 128] f32
    # AdaptiveAvgPool3d((1,1,1)) as a tiny averaging matmul: [BT, BT*S4] @ x4.
    pooled = jnp.dot(pool_ref[...], x4, preferred_element_type=jnp.float32)
    # Projection MLP (Dropout is identity in eval mode).
    h = jnp.dot(pooled.astype(jnp.bfloat16), w1_ref[...],
                preferred_element_type=jnp.float32)
    h = jnp.maximum(h + b1_ref[...], 0.0)
    y = jnp.dot(h.astype(jnp.bfloat16), w2_ref[...],
                preferred_element_type=jnp.float32)
    o_ref[...] = (y + b2_ref[...]).astype(o_ref.dtype)


def _tail_forward(a3, params):
    """conv4+BN+ReLU, adaptive avg-pool, and the projection MLP in ONE pallas_call."""
    w4, b4, g4, be4, mu4, v4 = params["convs"][3]
    cout4 = w4.shape[0]                                    # 128
    w4_2d, shift4 = _fold_bn(w4, b4, g4, be4, mu4, v4)

    patches4, (n, do, ho, wo) = _im2col_3x3x3_s2_cl(a3)
    s4 = do * ho * wo
    m4, k4 = patches4.shape                                # m4 = n * s4
    pool_mat = jnp.kron(jnp.eye(n, dtype=jnp.float32),
                        jnp.full((1, s4), 1.0 / s4, jnp.float32))   # [n, n*s4]

    fc1_w, fc1_b = params["fc1_w"], params["fc1_b"]
    fc2_w, fc2_b = params["fc2_w"], params["fc2_b"]
    fc1_in, emb = fc1_w.shape
    outd = fc2_w.shape[1]

    return pl.pallas_call(
        _tail_kernel,
        out_shape=jax.ShapeDtypeStruct((n, outd), jnp.float32),
        grid_spec=pltpu.PrefetchScalarGridSpec(
            num_scalar_prefetch=0,
            grid=(1,),
            in_specs=[
                pl.BlockSpec((m4, k4), lambda i: (0, 0)),
                pl.BlockSpec((k4, cout4), lambda i: (0, 0)),
                pl.BlockSpec((1, cout4), lambda i: (0, 0)),
                pl.BlockSpec((n, m4), lambda i: (0, 0)),
                pl.BlockSpec((fc1_in, emb), lambda i: (0, 0)),
                pl.BlockSpec((1, emb), lambda i: (0, 0)),
                pl.BlockSpec((emb, outd), lambda i: (0, 0)),
                pl.BlockSpec((1, outd), lambda i: (0, 0)),
            ],
            out_specs=pl.BlockSpec((n, outd), lambda i: (0, 0)),
        ),
        compiler_params=pltpu.CompilerParams(
            dimension_semantics=("arbitrary",)),
    )(patches4.astype(jnp.bfloat16),
      w4_2d.astype(jnp.bfloat16),
      shift4.reshape(1, cout4).astype(jnp.float32),
      pool_mat,
      fc1_w.astype(jnp.bfloat16),
      fc1_b.reshape(1, emb).astype(jnp.float32),
      fc2_w.astype(jnp.bfloat16),
      fc2_b.reshape(1, outd).astype(jnp.float32))


# ---------------------------------------------------------------------------
# Parameter construction (deterministic, synthetic)
# ---------------------------------------------------------------------------
def init_params(key, embedding_dim, output_dim):
    conv_channels = [(1, 16), (16, 32), (32, 64), (64, 128)]
    params = {"convs": []}
    keys = jax.random.split(key, 4 * 6 + 4)
    ki = 0
    for cin, cout in conv_channels:
        w = 0.1 * jax.random.normal(keys[ki], (cout, cin, 3, 3, 3), jnp.float32); ki += 1
        b = 0.1 * jax.random.normal(keys[ki], (cout,), jnp.float32); ki += 1
        gamma = 1.0 + 0.1 * jax.random.normal(keys[ki], (cout,), jnp.float32); ki += 1
        beta = 0.1 * jax.random.normal(keys[ki], (cout,), jnp.float32); ki += 1
        mean = 0.1 * jax.random.normal(keys[ki], (cout,), jnp.float32); ki += 1
        var = 1.0 + 0.1 * jnp.abs(jax.random.normal(keys[ki], (cout,), jnp.float32)); ki += 1
        params["convs"].append((w, b, gamma, beta, mean, var))
    params["fc1_w"] = 0.1 * jax.random.normal(keys[ki], (128, embedding_dim), jnp.float32); ki += 1
    params["fc1_b"] = 0.1 * jax.random.normal(keys[ki], (embedding_dim,), jnp.float32); ki += 1
    params["fc2_w"] = 0.1 * jax.random.normal(keys[ki], (embedding_dim, output_dim), jnp.float32); ki += 1
    params["fc2_b"] = 0.1 * jax.random.normal(keys[ki], (output_dim,), jnp.float32); ki += 1
    return params


# ---------------------------------------------------------------------------
# Forward pass
# ---------------------------------------------------------------------------
def head_sphere_guidance_forward(params, x):
    """x: [B, T, 1, R, R, R] -> [B, T, output_dim]."""
    b, t, c, d, h, w = x.shape
    a = x.reshape(b * t, c, d, h, w)                    # (b t) c d h w
    # Channels-last bf16 activations for the whole conv stack (C=1 here, so the
    # transpose is effectively a reshape); NCDHW never comes back.
    a = jnp.transpose(a, (0, 2, 3, 4, 1)).astype(jnp.bfloat16)
    for layer in params["convs"][:3]:
        a = conv3d_bn_relu(a, *layer)
    y = _tail_forward(a, params)                        # [B*T, output_dim] f32
    return y.reshape(b, t, -1)


if __name__ == "__main__":
    # Small, module-consistent shapes: batch=2, frames=2, sphere_resolution=16,
    # embedding_dim=64, output_dim=32.
    B, T, R = 2, 2, 16
    EMB, OUT = 64, 32

    key = jax.random.PRNGKey(0)
    pkey, xkey = jax.random.split(key)
    params = init_params(pkey, EMB, OUT)
    x = jax.random.normal(xkey, (B, T, 1, R, R, R), jnp.float32)

    fwd = jax.jit(head_sphere_guidance_forward)
    out = fwd(params, x)
    jax.block_until_ready(out)
    assert out.shape == (B, T, OUT), out.shape
    print("KERNEL_OK")
</pallas_src>

<mosaic_0001>
module attributes {stable_mosaic.version = 11 : i64} {
  func.func @_gemm_bias_relu_kernel(%arg0: i32, %arg1: memref<1024x27xbf16, #tpu.memory_space<vmem>>, %arg2: memref<27x128xbf16, #tpu.memory_space<vmem>>, %arg3: memref<1x128xf32, #tpu.memory_space<vmem>>, %arg4: memref<1024x128xbf16, #tpu.memory_space<vmem>>) attributes {dimension_semantics = [#tpu.dimension_semantics<parallel>], iteration_bounds = array<i64: 2>, scalar_prefetch = 0 : i64, scratch_operands = 0 : i64, tpu.core_type = #tpu.core_type<tc>, window_params = [{transform_indices = @transform_0, window_bounds = array<i64: 1024, 27>}, {pipeline_mode = #tpu.pipeline_mode<synchronous>, transform_indices = @transform_1, window_bounds = array<i64: 27, 128>}, {pipeline_mode = #tpu.pipeline_mode<synchronous>, transform_indices = @transform_2, window_bounds = array<i64: 1, 128>}, {transform_indices = @transform_3, window_bounds = array<i64: 1024, 128>}]} {
    %c0 = arith.constant 0 : index
    %c0_0 = arith.constant 0 : index
    %0 = vector.load %arg1[%c0, %c0_0] : memref<1024x27xbf16, #tpu.memory_space<vmem>>, vector<1024x27xbf16>
    %c0_1 = arith.constant 0 : index
    %c0_2 = arith.constant 0 : index
    %1 = vector.load %arg2[%c0_1, %c0_2] : memref<27x128xbf16, #tpu.memory_space<vmem>>, vector<27x128xbf16>
    %cst = arith.constant dense<0.000000e+00> : vector<1024x128xf32>
    %2 = tpu.matmul %0, %1, %cst {dimension_numbers = #tpu.dot_dimension_numbers<[1], [0], [0], [1], [0, 0, 1, 1], [], []>} : vector<1024x27xbf16>, vector<27x128xbf16>, vector<1024x128xf32> -> vector<1024x128xf32>
    %c0_3 = arith.constant 0 : index
    %c0_4 = arith.constant 0 : index
    %3 = vector.load %arg3[%c0_3, %c0_4] : memref<1x128xf32, #tpu.memory_space<vmem>>, vector<1x128xf32>
    %4 = vector.broadcast %3 : vector<1x128xf32> to vector<1024x128xf32>
    %5 = arith.addf %2, %4 : vector<1024x128xf32>
    %cst_5 = arith.constant 0.000000e+00 : f32
    %6 = vector.broadcast %cst_5 : f32 to vector<1024x128xf32>
    %7 = arith.maximumf %5, %6 : vector<1024x128xf32>
    %8 = arith.truncf %7 : vector<1024x128xf32> to vector<1024x128xbf16>
    %c0_6 = arith.constant 0 : index
    %c0_7 = arith.constant 0 : index
    %9 = vector.load %arg4[%c0_6, %c0_7] : memref<1024x128xbf16, #tpu.memory_space<vmem>>, vector<1024x128xbf16>
    tpu.vector_store %arg4[%c0_6, %c0_7], %8 {strides = array<i32>} : memref<1024x128xbf16, #tpu.memory_space<vmem>>, vector<1024x128xbf16>,
    return
  }
  func.func @transform_0(%arg0: i32) -> (i32, i32) {
    %c0_i32 = arith.constant 0 : i32
    %c0_i32_0 = arith.constant 0 : i32
    return %arg0, %c0_i32 : i32, i32
  }
  func.func @transform_1(%arg0: i32) -> (i32, i32) {
    %c0_i32 = arith.constant 0 : i32
    %c0_i32_0 = arith.constant 0 : i32
    %c0_i32_1 = arith.constant 0 : i32
    return %c0_i32, %c0_i32_0 : i32, i32
  }
  func.func @transform_2(%arg0: i32) -> (i32, i32) {
    %c0_i32 = arith.constant 0 : i32
    %c0_i32_0 = arith.constant 0 : i32
    %c0_i32_1 = arith.constant 0 : i32
    return %c0_i32, %c0_i32_0 : i32, i32
  }
  func.func @transform_3(%arg0: i32) -> (i32, i32) {
    %c0_i32 = arith.constant 0 : i32
    %c0_i32_0 = arith.constant 0 : i32
    return %arg0, %c0_i32 : i32, i32
  }
}

module attributes {stable_mosaic.version = 11 : i64} {
  func.func @_gemm_bias_relu_kernel(%arg0: i32, %arg1: memref<128x432xbf16, #tpu.memory_space<vmem>>, %arg2: memref<432x128xbf16, #tpu.memory_space<vmem>>, %arg3: memref<1x128xf32, #tpu.memory_space<vmem>>, %arg4: memref<128x128xbf16, #tpu.memory_space<vmem>>) attributes {dimension_semantics = [#tpu.dimension_semantics<parallel>], iteration_bounds = array<i64: 2>, scalar_prefetch = 0 : i64, scratch_operands = 0 : i64, tpu.core_type = #tpu.core_type<tc>, window_params = [{transform_indices = @transform_0, window_bounds = array<i64: 128, 432>}, {pipeline_mode = #tpu.pipeline_mode<synchronous>, transform_indices = @transform_1, window_bounds = array<i64: 432, 128>}, {pipeline_mode = #tpu.pipeline_mode<synchronous>, transform_indices = @transform_2, window_bounds = array<i64: 1, 128>}, {transform_indices = @transform_3, window_bounds = array<i64: 128, 128>}]} {
    %c0 = arith.constant 0 : index
    %c0_0 = arith.constant 0 : index
    %0 = vector.load %arg1[%c0, %c0_0] : memref<128x432xbf16, #tpu.memory_space<vmem>>, vector<128x432xbf16>
    %c0_1 = arith.constant 0 : index
    %c0_2 = arith.constant 0 : index
    %1 = vector.load %arg2[%c0_1, %c0_2] : memref<432x128xbf16, #tpu.memory_space<vmem>>, vector<432x128xbf16>
    %cst = arith.constant dense<0.000000e+00> : vector<128x128xf32>
    %2 = tpu.matmul %0, %1, %cst {dimension_numbers = #tpu.dot_dimension_numbers<[1], [0], [0], [1], [0, 0, 1, 1], [], []>} : vector<128x432xbf16>, vector<432x128xbf16>, vector<128x128xf32> -> vector<128x128xf32>
    %c0_3 = arith.constant 0 : index
    %c0_4 = arith.constant 0 : index
    %3 = vector.load %arg3[%c0_3, %c0_4] : memref<1x128xf32, #tpu.memory_space<vmem>>, vector<1x128xf32>
    %4 = vector.broadcast %3 : vector<1x128xf32> to vector<128x128xf32>
    %5 = arith.addf %2, %4 : vector<128x128xf32>
    %cst_5 = arith.constant 0.000000e+00 : f32
    %6 = vector.broadcast %cst_5 : f32 to vector<128x128xf32>
    %7 = arith.maximumf %5, %6 : vector<128x128xf32>
    %8 = arith.truncf %7 : vector<128x128xf32> to vector<128x128xbf16>
    %c0_6 = arith.constant 0 : index
    %c0_7 = arith.constant 0 : index
    %9 = vector.load %arg4[%c0_6, %c0_7] : memref<128x128xbf16, #tpu.memory_space<vmem>>, vector<128x128xbf16>
    tpu.vector_store %arg4[%c0_6, %c0_7], %8 {strides = array<i32>} : memref<128x128xbf16, #tpu.memory_space<vmem>>, vector<128x128xbf16>,
    return
  }
  func.func @transform_0(%arg0: i32) -> (i32, i32) {
    %c0_i32 = arith.constant 0 : i32
    %c0_i32_0 = arith.constant 0 : i32
    return %arg0, %c0_i32 : i32, i32
  }
  func.func @transform_1(%arg0: i32) -> (i32, i32) {
    %c0_i32 = arith.constant 0 : i32
    %c0_i32_0 = arith.constant 0 : i32
    %c0_i32_1 = arith.constant 0 : i32
    return %c0_i32, %c0_i32_0 : i32, i32
  }
  func.func @transform_2(%arg0: i32) -> (i32, i32) {
    %c0_i32 = arith.constant 0 : i32
    %c0_i32_0 = arith.constant 0 : i32
    %c0_i32_1 = arith.constant 0 : i32
    return %c0_i32, %c0_i32_0 : i32, i32
  }
  func.func @transform_3(%arg0: i32) -> (i32, i32) {
    %c0_i32 = arith.constant 0 : i32
    %c0_i32_0 = arith.constant 0 : i32
    return %arg0, %c0_i32 : i32, i32
  }
}

module attributes {stable_mosaic.version = 11 : i64} {
  func.func @_gemm_bias_relu_kernel(%arg0: i32, %arg1: memref<32x864xbf16, #tpu.memory_space<vmem>>, %arg2: memref<864x128xbf16, #tpu.memory_space<vmem>>, %arg3: memref<1x128xf32, #tpu.memory_space<vmem>>, %arg4: memref<32x128xbf16, #tpu.memory_space<vmem>>) attributes {dimension_semantics = [#tpu.dimension_semantics<parallel>], iteration_bounds = array<i64: 1>, scalar_prefetch = 0 : i64, scratch_operands = 0 : i64, tpu.core_type = #tpu.core_type<tc>, window_params = [{transform_indices = @transform_0, window_bounds = array<i64: 32, 864>}, {pipeline_mode = #tpu.pipeline_mode<synchronous>, transform_indices = @transform_1, window_bounds = array<i64: 864, 128>}, {pipeline_mode = #tpu.pipeline_mode<synchronous>, transform_indices = @transform_2, window_bounds = array<i64: 1, 128>}, {transform_indices = @transform_3, window_bounds = array<i64: 32, 128>}]} {
    %c0 = arith.constant 0 : index
    %c0_0 = arith.constant 0 : index
    %0 = vector.load %arg1[%c0, %c0_0] : memref<32x864xbf16, #tpu.memory_space<vmem>>, vector<32x864xbf16>
    %c0_1 = arith.constant 0 : index
    %c0_2 = arith.constant 0 : index
    %1 = vector.load %arg2[%c0_1, %c0_2] : memref<864x128xbf16, #tpu.memory_space<vmem>>, vector<864x128xbf16>
    %cst = arith.constant dense<0.000000e+00> : vector<32x128xf32>
    %2 = tpu.matmul %0, %1, %cst {dimension_numbers = #tpu.dot_dimension_numbers<[1], [0], [0], [1], [0, 0, 1, 1], [], []>} : vector<32x864xbf16>, vector<864x128xbf16>, vector<32x128xf32> -> vector<32x128xf32>
    %c0_3 = arith.constant 0 : index
    %c0_4 = arith.constant 0 : index
    %3 = vector.load %arg3[%c0_3, %c0_4] : memref<1x128xf32, #tpu.memory_space<vmem>>, vector<1x128xf32>
    %4 = vector.broadcast %3 : vector<1x128xf32> to vector<32x128xf32>
    %5 = arith.addf %2, %4 : vector<32x128xf32>
    %cst_5 = arith.constant 0.000000e+00 : f32
    %6 = vector.broadcast %cst_5 : f32 to vector<32x128xf32>
    %7 = arith.maximumf %5, %6 : vector<32x128xf32>
    %8 = arith.truncf %7 : vector<32x128xf32> to vector<32x128xbf16>
    %c0_6 = arith.constant 0 : index
    %c0_7 = arith.constant 0 : index
    %9 = vector.load %arg4[%c0_6, %c0_7] : memref<32x128xbf16, #tpu.memory_space<vmem>>, vector<32x128xbf16>
    tpu.vector_store %arg4[%c0_6, %c0_7], %8 {strides = array<i32>} : memref<32x128xbf16, #tpu.memory_space<vmem>>, vector<32x128xbf16>,
    return
  }
  func.func @transform_0(%arg0: i32) -> (i32, i32) {
    %c0_i32 = arith.constant 0 : i32
    %c0_i32_0 = arith.constant 0 : i32
    return %arg0, %c0_i32 : i32, i32
  }
  func.func @transform_1(%arg0: i32) -> (i32, i32) {
    %c0_i32 = arith.constant 0 : i32
    %c0_i32_0 = arith.constant 0 : i32
    %c0_i32_1 = arith.constant 0 : i32
    return %c0_i32, %c0_i32_0 : i32, i32
  }
  func.func @transform_2(%arg0: i32) -> (i32, i32) {
    %c0_i32 = arith.constant 0 : i32
    %c0_i32_0 = arith.constant 0 : i32
    %c0_i32_1 = arith.constant 0 : i32
    return %c0_i32, %c0_i32_0 : i32, i32
  }
  func.func @transform_3(%arg0: i32) -> (i32, i32) {
    %c0_i32 = arith.constant 0 : i32
    %c0_i32_0 = arith.constant 0 : i32
    return %arg0, %c0_i32 : i32, i32
  }
}

module attributes {stable_mosaic.version = 11 : i64} {
  func.func @_tail_kernel(%arg0: i32, %arg1: memref<4x1728xbf16, #tpu.memory_space<vmem>>, %arg2: memref<1728x128xbf16, #tpu.memory_space<vmem>>, %arg3: memref<1x128xf32, #tpu.memory_space<vmem>>, %arg4: memref<4x4xf32, #tpu.memory_space<vmem>>, %arg5: memref<128x64xbf16, #tpu.memory_space<vmem>>, %arg6: memref<1x64xf32, #tpu.memory_space<vmem>>, %arg7: memref<64x32xbf16, #tpu.memory_space<vmem>>, %arg8: memref<1x32xf32, #tpu.memory_space<vmem>>, %arg9: memref<4x32xf32, #tpu.memory_space<vmem>>) attributes {dimension_semantics = [#tpu.dimension_semantics<arbitrary>], iteration_bounds = array<i64: 1>, scalar_prefetch = 0 : i64, scratch_operands = 0 : i64, tpu.core_type = #tpu.core_type<tc>, window_params = [{pipeline_mode = #tpu.pipeline_mode<synchronous>, transform_indices = @transform_0, window_bounds = array<i64: 4, 1728>}, {pipeline_mode = #tpu.pipeline_mode<synchronous>, transform_indices = @transform_1, window_bounds = array<i64: 1728, 128>}, {pipeline_mode = #tpu.pipeline_mode<synchronous>, transform_indices = @transform_2, window_bounds = array<i64: 1, 128>}, {pipeline_mode = #tpu.pipeline_mode<synchronous>, transform_indices = @transform_3, window_bounds = array<i64: 4, 4>}, {pipeline_mode = #tpu.pipeline_mode<synchronous>, transform_indices = @transform_4, window_bounds = array<i64: 128, 64>}, {pipeline_mode = #tpu.pipeline_mode<synchronous>, transform_indices = @transform_5, window_bounds = array<i64: 1, 64>}, {pipeline_mode = #tpu.pipeline_mode<synchronous>, transform_indices = @transform_6, window_bounds = array<i64: 64, 32>}, {pipeline_mode = #tpu.pipeline_mode<synchronous>, transform_indices = @transform_7, window_bounds = array<i64: 1, 32>}, {pipeline_mode = #tpu.pipeline_mode<synchronous>, transform_indices = @transform_8, window_bounds = array<i64: 4, 32>}]} {
    %c0 = arith.constant 0 : index
    %c0_0 = arith.constant 0 : index
    %0 = vector.load %arg1[%c0, %c0_0] : memref<4x1728xbf16, #tpu.memory_space<vmem>>, vector<4x1728xbf16>
    %c0_1 = arith.constant 0 : index
    %c0_2 = arith.constant 0 : index
    %1 = vector.load %arg2[%c0_1, %c0_2] : memref<1728x128xbf16, #tpu.memory_space<vmem>>, vector<1728x128xbf16>
    %cst = arith.constant dense<0.000000e+00> : vector<4x128xf32>
    %2 = tpu.matmul %0, %1, %cst {dimension_numbers = #tpu.dot_dimension_numbers<[1], [0], [0], [1], [0, 0, 1, 1], [], []>} : vector<4x1728xbf16>, vector<1728x128xbf16>, vector<4x128xf32> -> vector<4x128xf32>
    %c0_3 = arith.constant 0 : index
    %c0_4 = arith.constant 0 : index
    %3 = vector.load %arg3[%c0_3, %c0_4] : memref<1x128xf32, #tpu.memory_space<vmem>>, vector<1x128xf32>
    %4 = vector.broadcast %3 : vector<1x128xf32> to vector<4x128xf32>
    %5 = arith.addf %2, %4 : vector<4x128xf32>
    %cst_5 = arith.constant 0.000000e+00 : f32
    %6 = vector.broadcast %cst_5 : f32 to vector<4x128xf32>
    %7 = arith.maximumf %5, %6 : vector<4x128xf32>
    %c0_6 = arith.constant 0 : index
    %c0_7 = arith.constant 0 : index
    %8 = vector.load %arg4[%c0_6, %c0_7] : memref<4x4xf32, #tpu.memory_space<vmem>>, vector<4x4xf32>
    %cst_8 = arith.constant dense<0.000000e+00> : vector<4x128xf32>
    %9 = tpu.matmul %8, %7, %cst_8 {dimension_numbers = #tpu.dot_dimension_numbers<[1], [0], [0], [1], [0, 0, 1, 1], [], []>} : vector<4x4xf32>, vector<4x128xf32>, vector<4x128xf32> -> vector<4x128xf32>
    %10 = arith.truncf %9 : vector<4x128xf32> to vector<4x128xbf16>
    %c0_9 = arith.constant 0 : index
    %c0_10 = arith.constant 0 : index
    %11 = vector.load %arg5[%c0_9, %c0_10] : memref<128x64xbf16, #tpu.memory_space<vmem>>, vector<128x64xbf16>
    %cst_11 = arith.constant dense<0.000000e+00> : vector<4x64xf32>
    %12 = tpu.matmul %10, %11, %cst_11 {dimension_numbers = #tpu.dot_dimension_numbers<[1], [0], [0], [1], [0, 0, 1, 1], [], []>} : vector<4x128xbf16>, vector<128x64xbf16>, vector<4x64xf32> -> vector<4x64xf32>
    %c0_12 = arith.constant 0 : index
    %c0_13 = arith.constant 0 : index
    %13 = vector.load %arg6[%c0_12, %c0_13] : memref<1x64xf32, #tpu.memory_space<vmem>>, vector<1x64xf32>
    %14 = vector.broadcast %13 : vector<1x64xf32> to vector<4x64xf32>
    %15 = arith.addf %12, %14 : vector<4x64xf32>
    %cst_14 = arith.constant 0.000000e+00 : f32
    %16 = vector.broadcast %cst_14 : f32 to vector<4x64xf32>
    %17 = arith.maximumf %15, %16 : vector<4x64xf32>
    %18 = arith.truncf %17 : vector<4x64xf32> to vector<4x64xbf16>
    %c0_15 = arith.constant 0 : index
    %c0_16 = arith.constant 0 : index
    %19 = vector.load %arg7[%c0_15, %c0_16] : memref<64x32xbf16, #tpu.memory_space<vmem>>, vector<64x32xbf16>
    %cst_17 = arith.constant dense<0.000000e+00> : vector<4x32xf32>
    %20 = tpu.matmul %18, %19, %cst_17 {dimension_numbers = #tpu.dot_dimension_numbers<[1], [0], [0], [1], [0, 0, 1, 1], [], []>} : vector<4x64xbf16>, vector<64x32xbf16>, vector<4x32xf32> -> vector<4x32xf32>
    %c0_18 = arith.constant 0 : index
    %c0_19 = arith.constant 0 : index
    %21 = vector.load %arg8[%c0_18, %c0_19] : memref<1x32xf32, #tpu.memory_space<vmem>>, vector<1x32xf32>
    %22 = vector.broadcast %21 : vector<1x32xf32> to vector<4x32xf32>
    %23 = arith.addf %20, %22 : vector<4x32xf32>
    %c0_20 = arith.constant 0 : index
    %c0_21 = arith.constant 0 : index
    %24 = vector.load %arg9[%c0_20, %c0_21] : memref<4x32xf32, #tpu.memory_space<vmem>>, vector<4x32xf32>
    tpu.vector_store %arg9[%c0_20, %c0_21], %23 {strides = array<i32>} : memref<4x32xf32, #tpu.memory_space<vmem>>, vector<4x32xf32>,
    return
  }
  func.func @transform_0(%arg0: i32) -> (i32, i32) {
    %c0_i32 = arith.constant 0 : i32
    %c0_i32_0 = arith.constant 0 : i32
    %c0_i32_1 = arith.constant 0 : i32
    return %c0_i32, %c0_i32_0 : i32, i32
  }
  func.func @transform_1(%arg0: i32) -> (i32, i32) {
    %c0_i32 = arith.constant 0 : i32
    %c0_i32_0 = arith.constant 0 : i32
    %c0_i32_1 = arith.constant 0 : i32
    return %c0_i32, %c0_i32_0 : i32, i32
  }
  func.func @transform_2(%arg0: i32) -> (i32, i32) {
    %c0_i32 = arith.constant 0 : i32
    %c0_i32_0 = arith.constant 0 : i32
    %c0_i32_1 = arith.constant 0 : i32
    return %c0_i32, %c0_i32_0 : i32, i32
  }
  func.func @transform_3(%arg0: i32) -> (i32, i32) {
    %c0_i32 = arith.constant 0 : i32
    %c0_i32_0 = arith.constant 0 : i32
    %c0_i32_1 = arith.constant 0 : i32
    return %c0_i32, %c0_i32_0 : i32, i32
  }
  func.func @transform_4(%arg0: i32) -> (i32, i32) {
    %c0_i32 = arith.constant 0 : i32
    %c0_i32_0 = arith.constant 0 : i32
    %c0_i32_1 = arith.constant 0 : i32
    return %c0_i32, %c0_i32_0 : i32, i32
  }
  func.func @transform_5(%arg0: i32) -> (i32, i32) {
    %c0_i32 = arith.constant 0 : i32
    %c0_i32_0 = arith.constant 0 : i32
    %c0_i32_1 = arith.constant 0 : i32
    return %c0_i32, %c0_i32_0 : i32, i32
  }
  func.func @transform_6(%arg0: i32) -> (i32, i32) {
    %c0_i32 = arith.constant 0 : i32
    %c0_i32_0 = arith.constant 0 : i32
    %c0_i32_1 = arith.constant 0 : i32
    return %c0_i32, %c0_i32_0 : i32, i32
  }
  func.func @transform_7(%arg0: i32) -> (i32, i32) {
    %c0_i32 = arith.constant 0 : i32
    %c0_i32_0 = arith.constant 0 : i32
    %c0_i32_1 = arith.constant 0 : i32
    return %c0_i32, %c0_i32_0 : i32, i32
  }
  func.func @transform_8(%arg0: i32) -> (i32, i32) {
    %c0_i32 = arith.constant 0 : i32
    %c0_i32_0 = arith.constant 0 : i32
    %c0_i32_1 = arith.constant 0 : i32
    return %c0_i32, %c0_i32_0 : i32, i32
  }
}

</mosaic_0001>

<bundles_post_ra>
// kernel: head_sphere_guidance_forward.4
= control target key start
LH: loop header
LB: loop body
LE: loop exit
PB: predicated region body
PF: predicated region fallthrough
CT: control target
= control target key end

     0   :  { %s3301_s12 = smov 0   ;;  %s3660_s0 = inlined_call_operand.vmem [shape: bf16[2048,27], index: 0, kind: input, shape index: {}]   ;;  %s3661_s1 = inlined_call_operand.vmem [shape: bf16[27,128], index: 1, kind: input, shape index: {}]   ;;  %s3662_s2 = inlined_call_operand.vmem [shape: f32[1,128], index: 2, kind: input, shape index: {}]   ;;  %s3663_s3 = inlined_call_operand.vmem [shape: bf16[2048,128], index: 3, kind: output, shape index: {}]  }
   0x1 LB: > { %s2214_s13 = sadd.s32 4294967295, %s3278_s12   ;;  %p2218_p0 = scmp.ge.s32.totalorder %s3278_s12, 1  ;;  %s3278_s12 = sphi %s3301_s12, %s13_s12  }
   0x2   : > { %p138_p1 = scmp.lt.s32.totalorder %s3278_s12, 3 }
   0x4   : > { %p139_p2 = pnand %p2218_p0, %p138_p1 }
   0x5   : > { %v3206_v0 = vld [vmem:[%s3661_s1] sm:$0xff] (!%p139_p2)   ;;  %vm838_vm0 = vcmask (!%p139_p2), 1044480   ;;  %v3207_v1 = vld [vmem:[%s3661_s1 + $0x8] sm:$0x3f] (!%p139_p2)   ;;  %vm839_vm1 = vcmask (!%p139_p2), 1045504   ;;  %s2219_s18 = sshll.u32 (!%p139_p2), %s2214_s13, 7 }
   0x6   : > { %142 = sbr.rel (%p139_p2) target bundleno = 361 (0x169), region = 32  ;;  %3061 = vmatprep.subr.bf16.mxu0 (!%p139_p2), %v3206_v0  ;;  %3193 = vmatprep.subr.bf16.mxu1 (!%p139_p2), %v3206_v0  ;;  %v3280_v2 = vmov (!%p139_p2), 65535   ;;  %p163_p3 = scmp.lt.s32.totalorder (!%p139_p2), %s2219_s18, 255  ;;  %vm645_vm2 = vcmask (!%p139_p2), 220160  }
   0x7   : > { %3062 = vmatpush3.bf16.msra.mxu0 (!%p139_p2), %v3206_v0  ;;  %3195 = vmatpush3.bf16.msra.mxu1 (!%p139_p2), %v3206_v0  ;;  %v840_v3 = vsel (!%p139_p2), %vm838_vm0, 4294967295, %v3280_v2 }
   0x8   : > { %v841_v4 = vsel (!%p139_p2), %vm839_vm1, %v840_v3, 0 }
   0x9   : > { %v843_v5 = vand.u32 (!%p139_p2), %v3207_v1, %v841_v4 }
   0xb   : > { %3063 = vmatprep.subr.bf16.mxu0 (!%p139_p2), %v843_v5  ;;  %3194 = vmatprep.subr.bf16.mxu1 (!%p139_p2), %v843_v5 }
   0xc   : > { %3064 = vmatpush3.bf16.msra.mxu0 (!%p139_p2), %v843_v5  ;;  %3196 = vmatpush3.bf16.msra.mxu1 (!%p139_p2), %v843_v5 }
   0xd   : > { %s3665_s18 = smov (!%p163_p3, %s2219_s18), 255 }
   0xe   : > { %s2220_s19 = sshll.u32 %s3665_s18, 2 }
   0xf   : > { %s3323_s22 = scalar_lea.vmem %s3660_s0, %s2220_s19  ;;  %s3471_s27 = scalar_lea.vmem %s3663_s3, %s2220_s19 }
  0x10   : > { %v3208_v6 = vld [vmem:[%s3323_s22] sm:$0xff]   ;;  %v3210_v8 = vld [vmem:[%s3323_s22 + $0x8] sm:$0xff]   ;;  %v3212_v10 = vld [vmem:[%s3323_s22 + $0x10] sm:$0xff]  }
  0x11   : > { %v3209_v7 = vld [vmem:[%s3323_s22 + $0x100] sm:$0xff]   ;;  %3065 = vmatprep.mubr.msk.bf16.mxu0 %vm645_vm2, %v3208_v6  ;;  %v3211_v9 = vld [vmem:[%s3323_s22 + $0x108] sm:$0xff]   ;;  %v3213_v11 = vld [vmem:[%s3323_s22 + $0x110] sm:$0xff]  }
  0x12   : > { %3129 = vmatprep.mubr.msk.bf16.mxu1 %vm645_vm2, %v3209_v7  ;;  %3066 = vmatmul.mubr.msk.bf16.vlgmr.msra.gmra.mrb[0].mxu0 %vm645_vm2, %v3210_v8  ;;  %v3214_v12 = vld [vmem:[%s3323_s22 + $0x18] sm:$0xff]   ;;  %v3216_v14 = vld [vmem:[%s3323_s22 + $0x20] sm:$0xff]   ;;  %v3218_v16 = vld [vmem:[%s3323_s22 + $0x28] sm:$0xff]  }
  0x13   : > { %3130 = vmatmul.mubr.msk.bf16.vlgmr.msra.gmra.mrb[0].mxu1 %vm645_vm2, %v3211_v9  ;;  %3069 = vmatprep.mubr.msk.bf16.mxu0 %vm645_vm2, %v3212_v10  ;;  %v3215_v13 = vld [vmem:[%s3323_s22 + $0x118] sm:$0xff]   ;;  %v3217_v15 = vld [vmem:[%s3323_s22 + $0x120] sm:$0xff]   ;;  %v3219_v17 = vld [vmem:[%s3323_s22 + $0x128] sm:$0xff]  }
  0x14   : > { %3133 = vmatprep.mubr.msk.bf16.mxu1 %vm645_vm2, %v3213_v11  ;;  %v3220_v18 = vld [vmem:[%s3323_s22 + $0x30] sm:$0xff]   ;;  %v3222_v20 = vld [vmem:[%s3323_s22 + $0x38] sm:$0xff]   ;;  %v3224_v22 = vld [vmem:[%s3323_s22 + $0x40] sm:$0xff]  }
  0x15   : > { %v3221_v19 = vld [vmem:[%s3323_s22 + $0x130] sm:$0xff]   ;;  %v3223_v21 = vld [vmem:[%s3323_s22 + $0x138] sm:$0xff]   ;;  %v3225_v23 = vld [vmem:[%s3323_s22 + $0x140] sm:$0xff]  }
  0x16   : > { %v3226_v24 = vld [vmem:[%s3323_s22 + $0x48] sm:$0xff]   ;;  %v3228_v26 = vld [vmem:[%s3323_s22 + $0x50] sm:$0xff]   ;;  %v3230_v28 = vld [vmem:[%s3323_s22 + $0x58] sm:$0xff]  }
  0x17   : > { %v3227_v25 = vld [vmem:[%s3323_s22 + $0x148] sm:$0xff]   ;;  %v3229_v27 = vld [vmem:[%s3323_s22 + $0x150] sm:$0xff]   ;;  %v3231_v29 = vld [vmem:[%s3323_s22 + $0x158] sm:$0xff]  }
  0x18   : > { %v3232_v30 = vld [vmem:[%s3323_s22 + $0x60] sm:$0xff]   ;;  %v3234_v32 = vld [vmem:[%s3323_s22 + $0x68] sm:$0xff]   ;;  %v3236_v34 = vld [vmem:[%s3323_s22 + $0x70] sm:$0xff]  }
  0x19   : > { %v3233_v31 = vld [vmem:[%s3323_s22 + $0x160] sm:$0xff]   ;;  %v3235_v33 = vld [vmem:[%s3323_s22 + $0x168] sm:$0xff]   ;;  %v3237_v35 = vld [vmem:[%s3323_s22 + $0x170] sm:$0xff]  }
  0x1a   : > { %3070 = vmatmul.mubr.msk.bf16.gmra.mrb[4].mxu0 %vm645_vm2, %v3214_v12  ;;  %v3238_v36 = vld [vmem:[%s3323_s22 + $0x78] sm:$0xff]   ;;  %v3240_v38 = vld [vmem:[%s3323_s22 + $0x80] sm:$0xff]   ;;  %v3242_v40 = vld [vmem:[%s3323_s22 + $0x88] sm:$0xff]  }
  0x1b   : > { %3134 = vmatmul.mubr.msk.bf16.gmra.mrb[4].mxu1 %vm645_vm2, %v3215_v13  ;;  %3073 = vmatprep.mubr.msk.bf16.mxu0 %vm645_vm2, %v3216_v14  ;;  %v3239_v37 = vld [vmem:[%s3323_s22 + $0x178] sm:$0xff]   ;;  %v3241_v39 = vld [vmem:[%s3323_s22 + $0x180] sm:$0xff]   ;;  %v3243_v41 = vld [vmem:[%s3323_s22 + $0x188] sm:$0xff]  }
  0x1c   : > { %3137 = vmatprep.mubr.msk.bf16.mxu1 %vm645_vm2, %v3217_v15  ;;  %v3244_v42 = vld [vmem:[%s3323_s22 + $0x90] sm:$0xff]   ;;  %v3246_v44 = vld [vmem:[%s3323_s22 + $0x98] sm:$0xff]   ;;  %v3248_v46 = vld [vmem:[%s3323_s22 + $0xa0] sm:$0xff]  }
  0x1d   : > { %v3245_v43 = vld [vmem:[%s3323_s22 + $0x190] sm:$0xff]   ;;  %v3247_v45 = vld [vmem:[%s3323_s22 + $0x198] sm:$0xff]   ;;  %v3249_v47 = vld [vmem:[%s3323_s22 + $0x1a0] sm:$0xff]  }
  0x1e   : > { %v3250_v48 = vld [vmem:[%s3323_s22 + $0xa8] sm:$0xff]   ;;  %v3252_v50 = vld [vmem:[%s3323_s22 + $0xb0] sm:$0xff]   ;;  %v3254_v52 = vld [vmem:[%s3323_s22 + $0xb8] sm:$0xff]  }
  0x1f   : > { %v3251_v49 = vld [vmem:[%s3323_s22 + $0x1a8] sm:$0xff]   ;;  %v3253_v51 = vld [vmem:[%s3323_s22 + $0x1b0] sm:$0xff]   ;;  %v3255_v53 = vld [vmem:[%s3323_s22 + $0x1b8] sm:$0xff]  }
  0x20   : > { %v3256_v54 = vld [vmem:[%s3323_s22 + $0xc0] sm:$0xff]   ;;  %v3258_v56 = vld [vmem:[%s3323_s22 + $0xc8] sm:$0xff]   ;;  %v3260_v58 = vld [vmem:[%s3323_s22 + $0xd0] sm:$0xff]  }
  0x21   : > { %v3257_v55 = vld [vmem:[%s3323_s22 + $0x1c0] sm:$0xff]   ;;  %v3259_v57 = vld [vmem:[%s3323_s22 + $0x1c8] sm:$0xff]   ;;  %v3261_v59 = vld [vmem:[%s3323_s22 + $0x1d0] sm:$0xff]  }
  0x22   : > { %3074 = vmatmul.mubr.msk.bf16.gmra.mrb[8].mxu0 %vm645_vm2, %v3218_v16  ;;  %v3262_v60 = vld [vmem:[%s3323_s22 + $0xd8] sm:$0xff]   ;;  %v3264_v62 = vld [vmem:[%s3323_s22 + $0xe0] sm:$0xff]   ;;  %v3266_v0 = vld [vmem:[%s3323_s22 + $0xe8] sm:$0xff]  }
  0x23   : > { %3138 = vmatmul.mubr.msk.bf16.gmra.mrb[8].mxu1 %vm645_vm2, %v3219_v17  ;;  %3077 = vmatprep.mubr.msk.bf16.mxu0 %vm645_vm2, %v3220_v18  ;;  %v3263_v61 = vld [vmem:[%s3323_s22 + $0x1d8] sm:$0xff]   ;;  %v3265_v63 = vld [vmem:[%s3323_s22 + $0x1e0] sm:$0xff]   ;;  %v3267_v1 = vld [vmem:[%s3323_s22 + $0x1e8] sm:$0xff]  }
  0x24   : > { %3141 = vmatprep.mubr.msk.bf16.mxu1 %vm645_vm2, %v3221_v19  ;;  %v3268_v2 = vld [vmem:[%s3323_s22 + $0xf0] sm:$0xff]   ;;  %v3270_v4 = vld [vmem:[%s3323_s22 + $0xf8] sm:$0xff]   ;;  %v3456_v6 = vld [vmem:[%s3662_s2] ss:$0 sm:$0xff] }
  0x25   : > { %v3269_v3 = vld [vmem:[%s3323_s22 + $0x1f0] sm:$0xff]   ;;  %v3271_v5 = vld [vmem:[%s3323_s22 + $0x1f8] sm:$0xff]  }
  0x2a   : > { %3078 = vmatmul.mubr.msk.bf16.gmra.mrb[12].mxu0 %vm645_vm2, %v3222_v20 }
  0x2b   : > { %3142 = vmatmul.mubr.msk.bf16.gmra.mrb[12].mxu1 %vm645_vm2, %v3223_v21  ;;  %3081 = vmatprep.mubr.msk.bf16.mxu0 %vm645_vm2, %v3224_v22 }
  0x2c   : > { %3145 = vmatprep.mubr.msk.bf16.mxu1 %vm645_vm2, %v3225_v23 }
  0x32   : > { %3082 = vmatmul.mubr.msk.bf16.gmra.mrb[16].mxu0 %vm645_vm2, %v3226_v24 }
  0x33   : > { %3146 = vmatmul.mubr.msk.bf16.gmra.mrb[16].mxu1 %vm645_vm2, %v3227_v25  ;;  %3085 = vmatprep.mubr.msk.bf16.mxu0 %vm645_vm2, %v3228_v26 }
  0x34   : > { %3149 = vmatprep.mubr.msk.bf16.mxu1 %vm645_vm2, %v3229_v27 }
  0x3a   : > { %3086 = vmatmul.mubr.msk.bf16.gmra.mrb[20].mxu0 %vm645_vm2, %v3230_v28 }
  0x3b   : > { %3150 = vmatmul.mubr.msk.bf16.gmra.mrb[20].mxu1 %vm645_vm2, %v3231_v29  ;;  %3089 = vmatprep.mubr.msk.bf16.mxu0 %vm645_vm2, %v3232_v30 }
  0x3c   : > { %3153 = vmatprep.mubr.msk.bf16.mxu1 %vm645_vm2, %v3233_v31 }
  0x42   : > { %3090 = vmatmul.mubr.msk.bf16.gmra.mrb[24].mxu0 %vm645_vm2, %v3234_v32 }
  0x43   : > { %3154 = vmatmul.mubr.msk.bf16.gmra.mrb[24].mxu1 %vm645_vm2, %v3235_v33  ;;  %3093 = vmatprep.mubr.msk.bf16.mxu0 %vm645_vm2, %v3236_v34 }
  0x44   : > { %3157 = vmatprep.mubr.msk.bf16.mxu1 %vm645_vm2, %v3237_v35 }
  0x4a   : > { %3094 = vmatmul.mubr.msk.bf16.gmra.mrb[28].mxu0 %vm645_vm2, %v3238_v36 }
  0x4b   : > { %3158 = vmatmul.mubr.msk.bf16.gmra.mrb[28].mxu1 %vm645_vm2, %v3239_v37  ;;  %3097 = vmatprep.mubr.msk.bf16.mxu0 %vm645_vm2, %v3240_v38 }
  0x4c   : > { %3161 = vmatprep.mubr.msk.bf16.mxu1 %vm645_vm2, %v3241_v39 }
  0x52   : > { %3098 = vmatmul.mubr.msk.bf16.gmra.mrb[32].mxu0 %vm645_vm2, %v3242_v40 }
  0x53   : > { %3162 = vmatmul.mubr.msk.bf16.gmra.mrb[32].mxu1 %vm645_vm2, %v3243_v41  ;;  %3101 = vmatprep.mubr.msk.bf16.mxu0 %vm645_vm2, %v3244_v42 }
  0x54   : > { %3165 = vmatprep.mubr.msk.bf16.mxu1 %vm645_vm2, %v3245_v43 }
  0x5a   : > { %3102 = vmatmul.mubr.msk.bf16.gmra.mrb[36].mxu0 %vm645_vm2, %v3246_v44 }
  0x5b   : > { %3166 = vmatmul.mubr.msk.bf16.gmra.mrb[36].mxu1 %vm645_vm2, %v3247_v45  ;;  %3105 = vmatprep.mubr.msk.bf16.mxu0 %vm645_vm2, %v3248_v46 }
  0x5c   : > { %3169 = vmatprep.mubr.msk.bf16.mxu1 %vm645_vm2, %v3249_v47 }
  0x62   : > { %3106 = vmatmul.mubr.msk.bf16.gmra.mrb[40].mxu0 %vm645_vm2, %v3250_v48 }
  0x63   : > { %3170 = vmatmul.mubr.msk.bf16.gmra.mrb[40].mxu1 %vm645_vm2, %v3251_v49  ;;  %3109 = vmatprep.mubr.msk.bf16.mxu0 %vm645_vm2, %v3252_v50 }
  0x64   : > { %3173 = vmatprep.mubr.msk.bf16.mxu1 %vm645_vm2, %v3253_v51 }
  0x6a   : > { %3110 = vmatmul.mubr.msk.bf16.gmra.mrb[44].mxu0 %vm645_vm2, %v3254_v52 }
  0x6b   : > { %3174 = vmatmul.mubr.msk.bf16.gmra.mrb[44].mxu1 %vm645_vm2, %v3255_v53  ;;  %3113 = vmatprep.mubr.msk.bf16.mxu0 %vm645_vm2, %v3256_v54 }
  0x6c   : > { %3177 = vmatprep.mubr.msk.bf16.mxu1 %vm645_vm2, %v3257_v55 }
  0x72   : > { %3114 = vmatmul.mubr.msk.bf16.gmra.mrb[48].mxu0 %vm645_vm2, %v3258_v56 }
  0x73   : > { %3178 = vmatmul.mubr.msk.bf16.gmra.mrb[48].mxu1 %vm645_vm2, %v3259_v57  ;;  %3117 = vmatprep.mubr.msk.bf16.mxu0 %vm645_vm2, %v3260_v58 }
  0x74   : > { %3181 = vmatprep.mubr.msk.bf16.mxu1 %vm645_vm2, %v3261_v59 }
  0x7a   : > { %3118 = vmatmul.mubr.msk.bf16.gmra.mrb[52].mxu0 %vm645_vm2, %v3262_v60 }
  0x7b   : > { %3182 = vmatmul.mubr.msk.bf16.gmra.mrb[52].mxu1 %vm645_vm2, %v3263_v61  ;;  %3121 = vmatprep.mubr.msk.bf16.mxu0 %vm645_vm2, %v3264_v62 }
  0x7c   : > { %3185 = vmatprep.mubr.msk.bf16.mxu1 %vm645_vm2, %v3265_v63 }
  0x82   : > { %3122 = vmatmul.mubr.msk.bf16.gmra.mrb[56].mxu0 %vm645_vm2, %v3266_v0 }
  0x83   : > { %3186 = vmatmul.mubr.msk.bf16.gmra.mrb[56].mxu1 %vm645_vm2, %v3267_v1  ;;  %3125 = vmatprep.mubr.msk.bf16.mxu0 %vm645_vm2, %v3268_v2 }
  0x84   : > { %3189 = vmatprep.mubr.msk.bf16.mxu1 %vm645_vm2, %v3269_v3 }
  0x8a   : > { %3126 = vmatmul.mubr.msk.bf16.gmra.mrb[60].mxu0 %vm645_vm2, %v3270_v4 }
  0x8b   : > { %3190 = vmatmul.mubr.msk.bf16.gmra.mrb[60].mxu1 %vm645_vm2, %v3271_v5 }
  0xe5   : > { %v3067_v7 = vpop.f32.mrb[0].mxu0 }
  0xe6   : > { %v888_v8 = vadd.f32 %v3067_v7, %v3456_v6  ;;  %v3131_v9 = vpop.f32.mrb[0].mxu1  ;;  %v879_v10 = vpop.f32.mrb[1].mxu0 }
  0xe7   : > { %v1144_v11 = vadd.f32 %v3131_v9, %v3456_v6  ;;  %v880_v12 = vadd.f32 %v3456_v6, %v879_v10  ;;  %v1135_v13 = vpop.f32.mrb[1].mxu1  ;;  %v3068_v14 = vpop.f32.mrb[2].mxu0 }
  0xe8   : > { %v1136_v15 = vadd.f32 %v3456_v6, %v1135_v13  ;;  %v891_v16 = vadd.f32 %v3068_v14, %v3456_v6  ;;  %v3132_v17 = vpop.f32.mrb[2].mxu1  ;;  %v882_v18 = vpop.f32.mrb[3].mxu0  ;;  %v1392_v22 = vmax.f32 %v888_v8, 0.0 }
  0xe9   : > { %v1147_v19 = vadd.f32 %v3132_v17, %v3456_v6  ;;  %v883_v20 = vadd.f32 %v3456_v6, %v882_v18  ;;  %v1138_v21 = vpop.f32.mrb[3].mxu1  ;;  %v1456_v25 = vmax.f32 %v1144_v11, 0.0  ;;  %v1390_v26 = vmax.f32 %v880_v12, 0.0 }
  0xea   : > { %v1393_v23 = vmax.f32 %v891_v16, 0.0  ;;  %v1139_v24 = vadd.f32 %v3456_v6, %v1138_v21  ;;  %v1454_v29 = vmax.f32 %v1136_v15, 0.0 }
  0xeb   : > { %v1457_v27 = vmax.f32 %v1147_v19, 0.0  ;;  %v1391_v28 = vmax.f32 %v883_v20, 0.0 }
  0xec   : > { %v2620_v30 = vpack.c.bf16 %v1393_v23, %v1392_v22  ;;  %v1455_v31 = vmax.f32 %v1139_v24, 0.0 }
  0xed   : > { %v2780_v32 = vpack.c.bf16 %v1457_v27, %v1456_v25  ;;  %v2615_v33 = vpack.c.bf16 %v1391_v28, %v1390_v26  ;;  %v3071_v34 = vpop.f32.mrb[4].mxu0 }
  0xee   : > { %2932 = vst [vmem:[%s3471_s27 + $0x8] sm:$0xff] %v2620_v30   ;;  %v2775_v35 = vpack.c.bf16 %v1455_v31, %v1454_v29  ;;  %v904_v36 = vadd.f32 %v3071_v34, %v3456_v6  ;;  %v3135_v37 = vpop.f32.mrb[4].mxu1  ;;  %v895_v38 = vpop.f32.mrb[5].mxu0 }
  0xef   : > { %2964 = vst [vmem:[%s3471_s27 + $0x108] sm:$0xff] %v2780_v32   ;;  %2616 = vst [vmem:[%s3471_s27] sm:$0xff] %v2615_v33   ;;  %v1160_v39 = vadd.f32 %v3135_v37, %v3456_v6  ;;  %v896_v40 = vadd.f32 %v3456_v6, %v895_v38  ;;  %v1151_v41 = vpop.f32.mrb[5].mxu1  ;;  %v3072_v42 = vpop.f32.mrb[6].mxu0 }
  0xf0   : > { %2963 = vst [vmem:[%s3471_s27 + $0x100] sm:$0xff] %v2775_v35   ;;  %v1152_v43 = vadd.f32 %v3456_v6, %v1151_v41  ;;  %v907_v44 = vadd.f32 %v3072_v42, %v3456_v6  ;;  %v3136_v45 = vpop.f32.mrb[6].mxu1  ;;  %v898_v46 = vpop.f32.mrb[7].mxu0  ;;  %v1396_v50 = vmax.f32 %v904_v36, 0.0 }
  0xf1   : > { %v1163_v47 = vadd.f32 %v3136_v45, %v3456_v6  ;;  %v899_v48 = vadd.f32 %v3456_v6, %v898_v46  ;;  %v1154_v49 = vpop.f32.mrb[7].mxu1  ;;  %v1460_v53 = vmax.f32 %v1160_v39, 0.0  ;;  %v1394_v54 = vmax.f32 %v896_v40, 0.0 }
  0xf2   : > { %v1397_v51 = vmax.f32 %v907_v44, 0.0  ;;  %v1155_v52 = vadd.f32 %v3456_v6, %v1154_v49  ;;  %v1458_v57 = vmax.f32 %v1152_v43, 0.0 }
  0xf3   : > { %v1461_v55 = vmax.f32 %v1163_v47, 0.0  ;;  %v1395_v56 = vmax.f32 %v899_v48, 0.0 }
  0xf4   : > { %v2630_v58 = vpack.c.bf16 %v1397_v51, %v1396_v50  ;;  %v1459_v59 = vmax.f32 %v1155_v52, 0.0 }
  0xf5   : > { %v2790_v60 = vpack.c.bf16 %v1461_v55, %v1460_v53  ;;  %v2625_v61 = vpack.c.bf16 %v1395_v56, %v1394_v54  ;;  %v3075_v62 = vpop.f32.mrb[8].mxu0 }
  0xf6   : > { %2934 = vst [vmem:[%s3471_s27 + $0x18] sm:$0xff] %v2630_v58   ;;  %v2785_v63 = vpack.c.bf16 %v1459_v59, %v1458_v57  ;;  %v920_v0 = vadd.f32 %v3075_v62, %v3456_v6  ;;  %v3139_v1 = vpop.f32.mrb[8].mxu1  ;;  %v911_v2 = vpop.f32.mrb[9].mxu0 }
  0xf7   : > { %2966 = vst [vmem:[%s3471_s27 + $0x118] sm:$0xff] %v2790_v60   ;;  %2933 = vst [vmem:[%s3471_s27 + $0x10] sm:$0xff] %v2625_v61   ;;  %v1176_v3 = vadd.f32 %v3139_v1, %v3456_v6  ;;  %v912_v4 = vadd.f32 %v3456_v6, %v911_v2  ;;  %v1167_v5 = vpop.f32.mrb[9].mxu1  ;;  %v3076_v7 = vpop.f32.mrb[10].mxu0 }
  0xf8   : > { %2965 = vst [vmem:[%s3471_s27 + $0x110] sm:$0xff] %v2785_v63   ;;  %v1168_v8 = vadd.f32 %v3456_v6, %v1167_v5  ;;  %v923_v9 = vadd.f32 %v3076_v7, %v3456_v6  ;;  %v3140_v10 = vpop.f32.mrb[10].mxu1  ;;  %v914_v11 = vpop.f32.mrb[11].mxu0  ;;  %v1400_v15 = vmax.f32 %v920_v0, 0.0 }
  0xf9   : > { %v1179_v12 = vadd.f32 %v3140_v10, %v3456_v6  ;;  %v915_v13 = vadd.f32 %v3456_v6, %v914_v11  ;;  %v1170_v14 = vpop.f32.mrb[11].mxu1  ;;  %v1464_v18 = vmax.f32 %v1176_v3, 0.0  ;;  %v1398_v19 = vmax.f32 %v912_v4, 0.0 }
  0xfa   : > { %v1401_v16 = vmax.f32 %v923_v9, 0.0  ;;  %v1171_v17 = vadd.f32 %v3456_v6, %v1170_v14  ;;  %v1462_v22 = vmax.f32 %v1168_v8, 0.0 }
  0xfb   : > { %v1465_v20 = vmax.f32 %v1179_v12, 0.0  ;;  %v1399_v21 = vmax.f32 %v915_v13, 0.0 }
  0xfc   : > { %v2640_v23 = vpack.c.bf16 %v1401_v16, %v1400_v15  ;;  %v1463_v24 = vmax.f32 %v1171_v17, 0.0 }
  0xfd   : > { %v2800_v25 = vpack.c.bf16 %v1465_v20, %v1464_v18  ;;  %v2635_v26 = vpack.c.bf16 %v1399_v21, %v1398_v19  ;;  %v3079_v27 = vpop.f32.mrb[12].mxu0 }
  0xfe   : > { %2936 = vst [vmem:[%s3471_s27 + $0x28] sm:$0xff] %v2640_v23   ;;  %v2795_v28 = vpack.c.bf16 %v1463_v24, %v1462_v22  ;;  %v936_v29 = vadd.f32 %v3079_v27, %v3456_v6  ;;  %v3143_v30 = vpop.f32.mrb[12].mxu1  ;;  %v927_v31 = vpop.f32.mrb[13].mxu0 }
  0xff   : > { %2968 = vst [vmem:[%s3471_s27 + $0x128] sm:$0xff] %v2800_v25   ;;  %2935 = vst [vmem:[%s3471_s27 + $0x20] sm:$0xff] %v2635_v26   ;;  %v1192_v32 = vadd.f32 %v3143_v30, %v3456_v6  ;;  %v928_v33 = vadd.f32 %v3456_v6, %v927_v31  ;;  %v1183_v34 = vpop.f32.mrb[13].mxu1  ;;  %v3080_v35 = vpop.f32.mrb[14].mxu0 }
 0x100   : > { %2967 = vst [vmem:[%s3471_s27 + $0x120] sm:$0xff] %v2795_v28   ;;  %v1184_v36 = vadd.f32 %v3456_v6, %v1183_v34  ;;  %v939_v37 = vadd.f32 %v3080_v35, %v3456_v6  ;;  %v3144_v38 = vpop.f32.mrb[14].mxu1  ;;  %v930_v39 = vpop.f32.mrb[15].mxu0  ;;  %v1404_v43 = vmax.f32 %v936_v29, 0.0 }
 0x101   : > { %v1195_v40 = vadd.f32 %v3144_v38, %v3456_v6  ;;  %v931_v41 = vadd.f32 %v3456_v6, %v930_v39  ;;  %v1186_v42 = vpop.f32.mrb[15].mxu1  ;;  %v1468_v46 = vmax.f32 %v1192_v32, 0.0  ;;  %v1402_v47 = vmax.f32 %v928_v33, 0.0 }
 0x102   : > { %v1405_v44 = vmax.f32 %v939_v37, 0.0  ;;  %v1187_v45 = vadd.f32 %v3456_v6, %v1186_v42  ;;  %v1466_v50 = vmax.f32 %v1184_v36, 0.0 }
 0x103   : > { %v1469_v48 = vmax.f32 %v1195_v40, 0.0  ;;  %v1403_v49 = vmax.f32 %v931_v41, 0.0 }
 0x104   : > { %v2650_v51 = vpack.c.bf16 %v1405_v44, %v1404_v43  ;;  %v1467_v52 = vmax.f32 %v1187_v45, 0.0 }
 0x105   : > { %v2810_v53 = vpack.c.bf16 %v1469_v48, %v1468_v46  ;;  %v2645_v54 = vpack.c.bf16 %v1403_v49, %v1402_v47  ;;  %v3083_v55 = vpop.f32.mrb[16].mxu0 }
 0x106   : > { %2938 = vst [vmem:[%s3471_s27 + $0x38] sm:$0xff] %v2650_v51   ;;  %v2805_v56 = vpack.c.bf16 %v1467_v52, %v1466_v50  ;;  %v952_v57 = vadd.f32 %v3083_v55, %v3456_v6  ;;  %v3147_v58 = vpop.f32.mrb[16].mxu1  ;;  %v943_v59 = vpop.f32.mrb[17].mxu0 }
 0x107   : > { %2970 = vst [vmem:[%s3471_s27 + $0x138] sm:$0xff] %v2810_v53   ;;  %2937 = vst [vmem:[%s3471_s27 + $0x30] sm:$0xff] %v2645_v54   ;;  %v1208_v60 = vadd.f32 %v3147_v58, %v3456_v6  ;;  %v944_v61 = vadd.f32 %v3456_v6, %v943_v59  ;;  %v1199_v62 = vpop.f32.mrb[17].mxu1  ;;  %v3084_v63 = vpop.f32.mrb[18].mxu0 }
 0x108   : > { %2969 = vst [vmem:[%s3471_s27 + $0x130] sm:$0xff] %v2805_v56   ;;  %v1200_v0 = vadd.f32 %v3456_v6, %v1199_v62  ;;  %v955_v1 = vadd.f32 %v3084_v63, %v3456_v6  ;;  %v3148_v2 = vpop.f32.mrb[18].mxu1  ;;  %v946_v3 = vpop.f32.mrb[19].mxu0  ;;  %v1408_v8 = vmax.f32 %v952_v57, 0.0 }
 0x109   : > { %v1211_v4 = vadd.f32 %v3148_v2, %v3456_v6  ;;  %v947_v5 = vadd.f32 %v3456_v6, %v946_v3  ;;  %v1202_v7 = vpop.f32.mrb[19].mxu1  ;;  %v1472_v11 = vmax.f32 %v1208_v60, 0.0  ;;  %v1406_v12 = vmax.f32 %v944_v61, 0.0 }
 0x10a   : > { %v1409_v9 = vmax.f32 %v955_v1, 0.0  ;;  %v1203_v10 = vadd.f32 %v3456_v6, %v1202_v7  ;;  %v1470_v15 = vmax.f32 %v1200_v0, 0.0 }
 0x10b   : > { %v1473_v13 = vmax.f32 %v1211_v4, 0.0  ;;  %v1407_v14 = vmax.f32 %v947_v5, 0.0 }
 0x10c   : > { %v2660_v16 = vpack.c.bf16 %v1409_v9, %v1408_v8  ;;  %v1471_v17 = vmax.f32 %v1203_v10, 0.0 }
 0x10d   : > { %v2820_v18 = vpack.c.bf16 %v1473_v13, %v1472_v11  ;;  %v2655_v19 = vpack.c.bf16 %v1407_v14, %v1406_v12  ;;  %v3087_v20 = vpop.f32.mrb[20].mxu0 }
 0x10e   : > { %2940 = vst [vmem:[%s3471_s27 + $0x48] sm:$0xff] %v2660_v16   ;;  %v2815_v21 = vpack.c.bf16 %v1471_v17, %v1470_v15  ;;  %v968_v22 = vadd.f32 %v3087_v20, %v3456_v6  ;;  %v3151_v23 = vpop.f32.mrb[20].mxu1  ;;  %v959_v24 = vpop.f32.mrb[21].mxu0 }
 0x10f   : > { %2972 = vst [vmem:[%s3471_s27 + $0x148] sm:$0xff] %v2820_v18   ;;  %2939 = vst [vmem:[%s3471_s27 + $0x40] sm:$0xff] %v2655_v19   ;;  %v1224_v25 = vadd.f32 %v3151_v23, %v3456_v6  ;;  %v960_v26 = vadd.f32 %v3456_v6, %v959_v24  ;;  %v1215_v27 = vpop.f32.mrb[21].mxu1  ;;  %v3088_v28 = vpop.f32.mrb[22].mxu0 }
 0x110   : > { %2971 = vst [vmem:[%s3471_s27 + $0x140] sm:$0xff] %v2815_v21   ;;  %v1216_v29 = vadd.f32 %v3456_v6, %v1215_v27  ;;  %v971_v30 = vadd.f32 %v3088_v28, %v3456_v6  ;;  %v3152_v31 = vpop.f32.mrb[22].mxu1  ;;  %v962_v32 = vpop.f32.mrb[23].mxu0  ;;  %v1412_v36 = vmax.f32 %v968_v22, 0.0 }
 0x111   : > { %v1227_v33 = vadd.f32 %v3152_v31, %v3456_v6  ;;  %v963_v34 = vadd.f32 %v3456_v6, %v962_v32  ;;  %v1218_v35 = vpop.f32.mrb[23].mxu1  ;;  %v1476_v39 = vmax.f32 %v1224_v25, 0.0  ;;  %v1410_v40 = vmax.f32 %v960_v26, 0.0 }
 0x112   : > { %v1413_v37 = vmax.f32 %v971_v30, 0.0  ;;  %v1219_v38 = vadd.f32 %v3456_v6, %v1218_v35  ;;  %v1474_v43 = vmax.f32 %v1216_v29, 0.0 }
 0x113   : > { %v1477_v41 = vmax.f32 %v1227_v33, 0.0  ;;  %v1411_v42 = vmax.f32 %v963_v34, 0.0 }
 0x114   : > { %v2670_v44 = vpack.c.bf16 %v1413_v37, %v1412_v36  ;;  %v1475_v45 = vmax.f32 %v1219_v38, 0.0 }
 0x115   : > { %v2830_v46 = vpack.c.bf16 %v1477_v41, %v1476_v39  ;;  %v2665_v47 = vpack.c.bf16 %v1411_v42, %v1410_v40  ;;  %v3091_v48 = vpop.f32.mrb[24].mxu0 }
 0x116   : > { %2942 = vst [vmem:[%s3471_s27 + $0x58] sm:$0xff] %v2670_v44   ;;  %v2825_v49 = vpack.c.bf16 %v1475_v45, %v1474_v43  ;;  %v984_v50 = vadd.f32 %v3091_v48, %v3456_v6  ;;  %v3155_v51 = vpop.f32.mrb[24].mxu1  ;;  %v975_v52 = vpop.f32.mrb[25].mxu0 }
 0x117   : > { %2974 = vst [vmem:[%s3471_s27 + $0x158] sm:$0xff] %v2830_v46   ;;  %2941 = vst [vmem:[%s3471_s27 + $0x50] sm:$0xff] %v2665_v47   ;;  %v1240_v53 = vadd.f32 %v3155_v51, %v3456_v6  ;;  %v976_v54 = vadd.f32 %v3456_v6, %v975_v52  ;;  %v1231_v55 = vpop.f32.mrb[25].mxu1  ;;  %v3092_v56 = vpop.f32.mrb[26].mxu0 }
 0x118   : > { %2973 = vst [vmem:[%s3471_s27 + $0x150] sm:$0xff] %v2825_v49   ;;  %v1232_v57 = vadd.f32 %v3456_v6, %v1231_v55  ;;  %v987_v58 = vadd.f32 %v3092_v56, %v3456_v6  ;;  %v3156_v59 = vpop.f32.mrb[26].mxu1  ;;  %v978_v60 = vpop.f32.mrb[27].mxu0  ;;  %v1416_v0 = vmax.f32 %v984_v50, 0.0 }
 0x119   : > { %v1243_v61 = vadd.f32 %v3156_v59, %v3456_v6  ;;  %v979_v62 = vadd.f32 %v3456_v6, %v978_v60  ;;  %v1234_v63 = vpop.f32.mrb[27].mxu1  ;;  %v1480_v3 = vmax.f32 %v1240_v53, 0.0  ;;  %v1414_v4 = vmax.f32 %v976_v54, 0.0 }
 0x11a   : > { %v1417_v1 = vmax.f32 %v987_v58, 0.0  ;;  %v1235_v2 = vadd.f32 %v3456_v6, %v1234_v63  ;;  %v1478_v8 = vmax.f32 %v1232_v57, 0.0 }
 0x11b   : > { %v1481_v5 = vmax.f32 %v1243_v61, 0.0  ;;  %v1415_v7 = vmax.f32 %v979_v62, 0.0 }
 0x11c   : > { %v2680_v9 = vpack.c.bf16 %v1417_v1, %v1416_v0  ;;  %v1479_v10 = vmax.f32 %v1235_v2, 0.0 }
 0x11d   : > { %v2840_v11 = vpack.c.bf16 %v1481_v5, %v1480_v3  ;;  %v2675_v12 = vpack.c.bf16 %v1415_v7, %v1414_v4  ;;  %v3095_v13 = vpop.f32.mrb[28].mxu0 }
 0x11e   : > { %2944 = vst [vmem:[%s3471_s27 + $0x68] sm:$0xff] %v2680_v9   ;;  %v2835_v14 = vpack.c.bf16 %v1479_v10, %v1478_v8  ;;  %v1000_v15 = vadd.f32 %v3095_v13, %v3456_v6  ;;  %v3159_v16 = vpop.f32.mrb[28].mxu1  ;;  %v991_v17 = vpop.f32.mrb[29].mxu0 }
 0x11f   : > { %2976 = vst [vmem:[%s3471_s27 + $0x168] sm:$0xff] %v2840_v11   ;;  %2943 = vst [vmem:[%s3471_s27 + $0x60] sm:$0xff] %v2675_v12   ;;  %v1256_v18 = vadd.f32 %v3159_v16, %v3456_v6  ;;  %v992_v19 = vadd.f32 %v3456_v6, %v991_v17  ;;  %v1247_v20 = vpop.f32.mrb[29].mxu1  ;;  %v3096_v21 = vpop.f32.mrb[30].mxu0 }
 0x120   : > { %2975 = vst [vmem:[%s3471_s27 + $0x160] sm:$0xff] %v2835_v14   ;;  %v1248_v22 = vadd.f32 %v3456_v6, %v1247_v20  ;;  %v1003_v23 = vadd.f32 %v3096_v21, %v3456_v6  ;;  %v3160_v24 = vpop.f32.mrb[30].mxu1  ;;  %v994_v25 = vpop.f32.mrb[31].mxu0  ;;  %v1420_v29 = vmax.f32 %v1000_v15, 0.0 }
 0x121   : > { %v1259_v26 = vadd.f32 %v3160_v24, %v3456_v6  ;;  %v995_v27 = vadd.f32 %v3456_v6, %v994_v25  ;;  %v1250_v28 = vpop.f32.mrb[31].mxu1  ;;  %v1484_v32 = vmax.f32 %v1256_v18, 0.0  ;;  %v1418_v33 = vmax.f32 %v992_v19, 0.0 }
 0x122   : > { %v1421_v30 = vmax.f32 %v1003_v23, 0.0  ;;  %v1251_v31 = vadd.f32 %v3456_v6, %v1250_v28  ;;  %v1482_v36 = vmax.f32 %v1248_v22, 0.0 }
 0x123   : > { %v1485_v34 = vmax.f32 %v1259_v26, 0.0  ;;  %v1419_v35 = vmax.f32 %v995_v27, 0.0 }
 0x124   : > { %v2690_v37 = vpack.c.bf16 %v1421_v30, %v1420_v29  ;;  %v1483_v38 = vmax.f32 %v1251_v31, 0.0 }
 0x125   : > { %v2850_v39 = vpack.c.bf16 %v1485_v34, %v1484_v32  ;;  %v2685_v40 = vpack.c.bf16 %v1419_v35, %v1418_v33  ;;  %v3099_v41 = vpop.f32.mrb[32].mxu0 }
 0x126   : > { %2946 = vst [vmem:[%s3471_s27 + $0x78] sm:$0xff] %v2690_v37   ;;  %v2845_v42 = vpack.c.bf16 %v1483_v38, %v1482_v36  ;;  %v1016_v43 = vadd.f32 %v3099_v41, %v3456_v6  ;;  %v3163_v44 = vpop.f32.mrb[32].mxu1  ;;  %v1007_v45 = vpop.f32.mrb[33].mxu0 }
 0x127   : > { %2978 = vst [vmem:[%s3471_s27 + $0x178] sm:$0xff] %v2850_v39   ;;  %2945 = vst [vmem:[%s3471_s27 + $0x70] sm:$0xff] %v2685_v40   ;;  %v1272_v46 = vadd.f32 %v3163_v44, %v3456_v6  ;;  %v1008_v47 = vadd.f32 %v3456_v6, %v1007_v45  ;;  %v1263_v48 = vpop.f32.mrb[33].mxu1  ;;  %v3100_v49 = vpop.f32.mrb[34].mxu0 }
 0x128   : > { %2977 = vst [vmem:[%s3471_s27 + $0x170] sm:$0xff] %v2845_v42   ;;  %v1264_v50 = vadd.f32 %v3456_v6, %v1263_v48  ;;  %v1019_v51 = vadd.f32 %v3100_v49, %v3456_v6  ;;  %v3164_v52 = vpop.f32.mrb[34].mxu1  ;;  %v1010_v53 = vpop.f32.mrb[35].mxu0  ;;  %v1424_v57 = vmax.f32 %v1016_v43, 0.0 }
 0x129   : > { %v1275_v54 = vadd.f32 %v3164_v52, %v3456_v6  ;;  %v1011_v55 = vadd.f32 %v3456_v6, %v1010_v53  ;;  %v1266_v56 = vpop.f32.mrb[35].mxu1  ;;  %v1488_v60 = vmax.f32 %v1272_v46, 0.0  ;;  %v1422_v61 = vmax.f32 %v1008_v47, 0.0 }
 0x12a   : > { %v1425_v58 = vmax.f32 %v1019_v51, 0.0  ;;  %v1267_v59 = vadd.f32 %v3456_v6, %v1266_v56  ;;  %v1486_v0 = vmax.f32 %v1264_v50, 0.0 }
 0x12b   : > { %v1489_v62 = vmax.f32 %v1275_v54, 0.0  ;;  %v1423_v63 = vmax.f32 %v1011_v55, 0.0 }
 0x12c   : > { %v2700_v1 = vpack.c.bf16 %v1425_v58, %v1424_v57  ;;  %v1487_v2 = vmax.f32 %v1267_v59, 0.0 }
 0x12d   : > { %v2860_v3 = vpack.c.bf16 %v1489_v62, %v1488_v60  ;;  %v2695_v4 = vpack.c.bf16 %v1423_v63, %v1422_v61  ;;  %v3103_v5 = vpop.f32.mrb[36].mxu0 }
 0x12e   : > { %2948 = vst [vmem:[%s3471_s27 + $0x88] sm:$0xff] %v2700_v1   ;;  %v2855_v7 = vpack.c.bf16 %v1487_v2, %v1486_v0  ;;  %v1032_v8 = vadd.f32 %v3103_v5, %v3456_v6  ;;  %v3167_v9 = vpop.f32.mrb[36].mxu1  ;;  %v1023_v10 = vpop.f32.mrb[37].mxu0 }
 0x12f   : > { %2980 = vst [vmem:[%s3471_s27 + $0x188] sm:$0xff] %v2860_v3   ;;  %2947 = vst [vmem:[%s3471_s27 + $0x80] sm:$0xff] %v2695_v4   ;;  %v1288_v11 = vadd.f32 %v3167_v9, %v3456_v6  ;;  %v1024_v12 = vadd.f32 %v3456_v6, %v1023_v10  ;;  %v1279_v13 = vpop.f32.mrb[37].mxu1  ;;  %v3104_v14 = vpop.f32.mrb[38].mxu0 }
 0x130   : > { %2979 = vst [vmem:[%s3471_s27 + $0x180] sm:$0xff] %v2855_v7   ;;  %v1280_v15 = vadd.f32 %v3456_v6, %v1279_v13  ;;  %v1035_v16 = vadd.f32 %v3104_v14, %v3456_v6  ;;  %v3168_v17 = vpop.f32.mrb[38].mxu1  ;;  %v1026_v18 = vpop.f32.mrb[39].mxu0  ;;  %v1428_v22 = vmax.f32 %v1032_v8, 0.0 }
 0x131   : > { %v1291_v19 = vadd.f32 %v3168_v17, %v3456_v6  ;;  %v1027_v20 = vadd.f32 %v3456_v6, %v1026_v18  ;;  %v1282_v21 = vpop.f32.mrb[39].mxu1  ;;  %v1492_v25 = vmax.f32 %v1288_v11, 0.0  ;;  %v1426_v26 = vmax.f32 %v1024_v12, 0.0 }
 0x132   : > { %v1429_v23 = vmax.f32 %v1035_v16, 0.0  ;;  %v1283_v24 = vadd.f32 %v3456_v6, %v1282_v21  ;;  %v1490_v29 = vmax.f32 %v1280_v15, 0.0 }
 0x133   : > { %v1493_v27 = vmax.f32 %v1291_v19, 0.0  ;;  %v1427_v28 = vmax.f32 %v1027_v20, 0.0 }
 0x134   : > { %v2710_v30 = vpack.c.bf16 %v1429_v23, %v1428_v22  ;;  %v1491_v31 = vmax.f32 %v1283_v24, 0.0 }
 0x135   : > { %v2870_v32 = vpack.c.bf16 %v1493_v27, %v1492_v25  ;;  %v2705_v33 = vpack.c.bf16 %v1427_v28, %v1426_v26  ;;  %v3107_v34 = vpop.f32.mrb[40].mxu0 }
 0x136   : > { %2950 = vst [vmem:[%s3471_s27 + $0x98] sm:$0xff] %v2710_v30   ;;  %v2865_v35 = vpack.c.bf16 %v1491_v31, %v1490_v29  ;;  %v1048_v36 = vadd.f32 %v3107_v34, %v3456_v6  ;;  %v3171_v37 = vpop.f32.mrb[40].mxu1  ;;  %v1039_v38 = vpop.f32.mrb[41].mxu0 }
 0x137   : > { %2982 = vst [vmem:[%s3471_s27 + $0x198] sm:$0xff] %v2870_v32   ;;  %2949 = vst [vmem:[%s3471_s27 + $0x90] sm:$0xff] %v2705_v33   ;;  %v1304_v39 = vadd.f32 %v3171_v37, %v3456_v6  ;;  %v1040_v40 = vadd.f32 %v3456_v6, %v1039_v38  ;;  %v1295_v41 = vpop.f32.mrb[41].mxu1  ;;  %v3108_v42 = vpop.f32.mrb[42].mxu0 }
 0x138   : > { %2981 = vst [vmem:[%s3471_s27 + $0x190] sm:$0xff] %v2865_v35   ;;  %v1296_v43 = vadd.f32 %v3456_v6, %v1295_v41  ;;  %v1051_v44 = vadd.f32 %v3108_v42, %v3456_v6  ;;  %v3172_v45 = vpop.f32.mrb[42].mxu1  ;;  %v1042_v46 = vpop.f32.mrb[43].mxu0  ;;  %v1432_v50 = vmax.f32 %v1048_v36, 0.0 }
 0x139   : > { %v1307_v47 = vadd.f32 %v3172_v45, %v3456_v6  ;;  %v1043_v48 = vadd.f32 %v3456_v6, %v1042_v46  ;;  %v1298_v49 = vpop.f32.mrb[43].mxu1  ;;  %v1496_v53 = vmax.f32 %v1304_v39, 0.0  ;;  %v1430_v54 = vmax.f32 %v1040_v40, 0.0 }
 0x13a   : > { %v1433_v51 = vmax.f32 %v1051_v44, 0.0  ;;  %v1299_v52 = vadd.f32 %v3456_v6, %v1298_v49  ;;  %v1494_v57 = vmax.f32 %v1296_v43, 0.0 }
 0x13b   : > { %v1497_v55 = vmax.f32 %v1307_v47, 0.0  ;;  %v1431_v56 = vmax.f32 %v1043_v48, 0.0 }
 0x13c   : > { %v2720_v58 = vpack.c.bf16 %v1433_v51, %v1432_v50  ;;  %v1495_v59 = vmax.f32 %v1299_v52, 0.0 }
 0x13d   : > { %v2880_v60 = vpack.c.bf16 %v1497_v55, %v1496_v53  ;;  %v2715_v61 = vpack.c.bf16 %v1431_v56, %v1430_v54  ;;  %v3111_v62 = vpop.f32.mrb[44].mxu0 }
 0x13e   : > { %2952 = vst [vmem:[%s3471_s27 + $0xa8] sm:$0xff] %v2720_v58   ;;  %v2875_v63 = vpack.c.bf16 %v1495_v59, %v1494_v57  ;;  %v1064_v0 = vadd.f32 %v3111_v62, %v3456_v6  ;;  %v3175_v1 = vpop.f32.mrb[44].mxu1  ;;  %v1055_v2 = vpop.f32.mrb[45].mxu0 }
 0x13f   : > { %2984 = vst [vmem:[%s3471_s27 + $0x1a8] sm:$0xff] %v2880_v60   ;;  %2951 = vst [vmem:[%s3471_s27 + $0xa0] sm:$0xff] %v2715_v61   ;;  %v1320_v3 = vadd.f32 %v3175_v1, %v3456_v6  ;;  %v1056_v4 = vadd.f32 %v3456_v6, %v1055_v2  ;;  %v1311_v5 = vpop.f32.mrb[45].mxu1  ;;  %v3112_v7 = vpop.f32.mrb[46].mxu0 }
 0x140   : > { %2983 = vst [vmem:[%s3471_s27 + $0x1a0] sm:$0xff] %v2875_v63   ;;  %v1312_v8 = vadd.f32 %v3456_v6, %v1311_v5  ;;  %v1067_v9 = vadd.f32 %v3112_v7, %v3456_v6  ;;  %v3176_v10 = vpop.f32.mrb[46].mxu1  ;;  %v1058_v11 = vpop.f32.mrb[47].mxu0  ;;  %v1436_v15 = vmax.f32 %v1064_v0, 0.0 }
 0x141   : > { %v1323_v12 = vadd.f32 %v3176_v10, %v3456_v6  ;;  %v1059_v13 = vadd.f32 %v3456_v6, %v1058_v11  ;;  %v1314_v14 = vpop.f32.mrb[47].mxu1  ;;  %v1500_v18 = vmax.f32 %v1320_v3, 0.0  ;;  %v1434_v19 = vmax.f32 %v1056_v4, 0.0 }
 0x142   : > { %v1437_v16 = vmax.f32 %v1067_v9, 0.0  ;;  %v1315_v17 = vadd.f32 %v3456_v6, %v1314_v14  ;;  %v1498_v22 = vmax.f32 %v1312_v8, 0.0 }
 0x143   : > { %v1501_v20 = vmax.f32 %v1323_v12, 0.0  ;;  %v1435_v21 = vmax.f32 %v1059_v13, 0.0 }
 0x144   : > { %v2730_v23 = vpack.c.bf16 %v1437_v16, %v1436_v15  ;;  %v1499_v24 = vmax.f32 %v1315_v17, 0.0 }
 0x145   : > { %v2890_v25 = vpack.c.bf16 %v1501_v20, %v1500_v18  ;;  %v2725_v26 = vpack.c.bf16 %v1435_v21, %v1434_v19  ;;  %v3115_v27 = vpop.f32.mrb[48].mxu0 }
 0x146   : > { %2954 = vst [vmem:[%s3471_s27 + $0xb8] sm:$0xff] %v2730_v23   ;;  %v2885_v28 = vpack.c.bf16 %v1499_v24, %v1498_v22  ;;  %v1080_v29 = vadd.f32 %v3115_v27, %v3456_v6  ;;  %v3179_v30 = vpop.f32.mrb[48].mxu1  ;;  %v1071_v31 = vpop.f32.mrb[49].mxu0 }
 0x147   : > { %2986 = vst [vmem:[%s3471_s27 + $0x1b8] sm:$0xff] %v2890_v25   ;;  %2953 = vst [vmem:[%s3471_s27 + $0xb0] sm:$0xff] %v2725_v26   ;;  %v1336_v32 = vadd.f32 %v3179_v30, %v3456_v6  ;;  %v1072_v33 = vadd.f32 %v3456_v6, %v1071_v31  ;;  %v1327_v34 = vpop.f32.mrb[49].mxu1  ;;  %v3116_v35 = vpop.f32.mrb[50].mxu0 }
 0x148   : > { %2985 = vst [vmem:[%s3471_s27 + $0x1b0] sm:$0xff] %v2885_v28   ;;  %v1328_v36 = vadd.f32 %v3456_v6, %v1327_v34  ;;  %v1083_v37 = vadd.f32 %v3116_v35, %v3456_v6  ;;  %v3180_v38 = vpop.f32.mrb[50].mxu1  ;;  %v1074_v39 = vpop.f32.mrb[51].mxu0  ;;  %v1440_v43 = vmax.f32 %v1080_v29, 0.0 }
 0x149   : > { %v1339_v40 = vadd.f32 %v3180_v38, %v3456_v6  ;;  %v1075_v41 = vadd.f32 %v3456_v6, %v1074_v39  ;;  %v1330_v42 = vpop.f32.mrb[51].mxu1  ;;  %v1504_v46 = vmax.f32 %v1336_v32, 0.0  ;;  %v1438_v47 = vmax.f32 %v1072_v33, 0.0 }
 0x14a   : > { %v1441_v44 = vmax.f32 %v1083_v37, 0.0  ;;  %v1331_v45 = vadd.f32 %v3456_v6, %v1330_v42  ;;  %v1502_v50 = vmax.f32 %v1328_v36, 0.0 }
 0x14b   : > { %v1505_v48 = vmax.f32 %v1339_v40, 0.0  ;;  %v1439_v49 = vmax.f32 %v1075_v41, 0.0 }
 0x14c   : > { %v2740_v51 = vpack.c.bf16 %v1441_v44, %v1440_v43  ;;  %v1503_v52 = vmax.f32 %v1331_v45, 0.0 }
 0x14d   : > { %v2900_v53 = vpack.c.bf16 %v1505_v48, %v1504_v46  ;;  %v2735_v54 = vpack.c.bf16 %v1439_v49, %v1438_v47  ;;  %v3119_v55 = vpop.f32.mrb[52].mxu0 }
 0x14e   : > { %2956 = vst [vmem:[%s3471_s27 + $0xc8] sm:$0xff] %v2740_v51   ;;  %v2895_v56 = vpack.c.bf16 %v1503_v52, %v1502_v50  ;;  %v1096_v57 = vadd.f32 %v3119_v55, %v3456_v6  ;;  %v3183_v58 = vpop.f32.mrb[52].mxu1  ;;  %v1087_v59 = vpop.f32.mrb[53].mxu0 }
 0x14f   : > { %2988 = vst [vmem:[%s3471_s27 + $0x1c8] sm:$0xff] %v2900_v53   ;;  %2955 = vst [vmem:[%s3471_s27 + $0xc0] sm:$0xff] %v2735_v54   ;;  %v1352_v60 = vadd.f32 %v3183_v58, %v3456_v6  ;;  %v1088_v61 = vadd.f32 %v3456_v6, %v1087_v59  ;;  %v1343_v62 = vpop.f32.mrb[53].mxu1  ;;  %v3120_v63 = vpop.f32.mrb[54].mxu0 }
 0x150   : > { %2987 = vst [vmem:[%s3471_s27 + $0x1c0] sm:$0xff] %v2895_v56   ;;  %v1344_v0 = vadd.f32 %v3456_v6, %v1343_v62  ;;  %v1099_v1 = vadd.f32 %v3120_v63, %v3456_v6  ;;  %v3184_v2 = vpop.f32.mrb[54].mxu1  ;;  %v1090_v3 = vpop.f32.mrb[55].mxu0  ;;  %v1444_v8 = vmax.f32 %v1096_v57, 0.0 }
 0x151   : > { %v1355_v4 = vadd.f32 %v3184_v2, %v3456_v6  ;;  %v1091_v5 = vadd.f32 %v3456_v6, %v1090_v3  ;;  %v1346_v7 = vpop.f32.mrb[55].mxu1  ;;  %v1508_v11 = vmax.f32 %v1352_v60, 0.0  ;;  %v1442_v12 = vmax.f32 %v1088_v61, 0.0 }
 0x152   : > { %v1445_v9 = vmax.f32 %v1099_v1, 0.0  ;;  %v1347_v10 = vadd.f32 %v3456_v6, %v1346_v7  ;;  %v1506_v15 = vmax.f32 %v1344_v0, 0.0 }
 0x153   : > { %v1509_v13 = vmax.f32 %v1355_v4, 0.0  ;;  %v1443_v14 = vmax.f32 %v1091_v5, 0.0 }
 0x154   : > { %v2750_v16 = vpack.c.bf16 %v1445_v9, %v1444_v8  ;;  %v1507_v17 = vmax.f32 %v1347_v10, 0.0 }
 0x155   : > { %v2910_v18 = vpack.c.bf16 %v1509_v13, %v1508_v11  ;;  %v2745_v19 = vpack.c.bf16 %v1443_v14, %v1442_v12  ;;  %v3123_v20 = vpop.f32.mrb[56].mxu0 }
 0x156   : > { %2958 = vst [vmem:[%s3471_s27 + $0xd8] sm:$0xff] %v2750_v16   ;;  %v2905_v21 = vpack.c.bf16 %v1507_v17, %v1506_v15  ;;  %v1112_v22 = vadd.f32 %v3123_v20, %v3456_v6  ;;  %v3187_v23 = vpop.f32.mrb[56].mxu1  ;;  %v1103_v24 = vpop.f32.mrb[57].mxu0 }
 0x157   : > { %2990 = vst [vmem:[%s3471_s27 + $0x1d8] sm:$0xff] %v2910_v18   ;;  %2957 = vst [vmem:[%s3471_s27 + $0xd0] sm:$0xff] %v2745_v19   ;;  %v1368_v25 = vadd.f32 %v3187_v23, %v3456_v6  ;;  %v1104_v26 = vadd.f32 %v3456_v6, %v1103_v24  ;;  %v1359_v27 = vpop.f32.mrb[57].mxu1  ;;  %v3124_v28 = vpop.f32.mrb[58].mxu0 }
 0x158   : > { %2989 = vst [vmem:[%s3471_s27 + $0x1d0] sm:$0xff] %v2905_v21   ;;  %v1360_v29 = vadd.f32 %v3456_v6, %v1359_v27  ;;  %v1115_v30 = vadd.f32 %v3124_v28, %v3456_v6  ;;  %v3188_v31 = vpop.f32.mrb[58].mxu1  ;;  %v1106_v32 = vpop.f32.mrb[59].mxu0  ;;  %v1448_v36 = vmax.f32 %v1112_v22, 0.0 }
 0x159   : > { %v1371_v33 = vadd.f32 %v3188_v31, %v3456_v6  ;;  %v1107_v34 = vadd.f32 %v3456_v6, %v1106_v32  ;;  %v1362_v35 = vpop.f32.mrb[59].mxu1  ;;  %v1512_v39 = vmax.f32 %v1368_v25, 0.0  ;;  %v1446_v40 = vmax.f32 %v1104_v26, 0.0 }
 0x15a   : > { %v1449_v37 = vmax.f32 %v1115_v30, 0.0  ;;  %v1363_v38 = vadd.f32 %v3456_v6, %v1362_v35  ;;  %v1510_v43 = vmax.f32 %v1360_v29, 0.0 }
 0x15b   : > { %v1513_v41 = vmax.f32 %v1371_v33, 0.0  ;;  %v1447_v42 = vmax.f32 %v1107_v34, 0.0 }
 0x15c   : > { %v2760_v44 = vpack.c.bf16 %v1449_v37, %v1448_v36  ;;  %v1511_v45 = vmax.f32 %v1363_v38, 0.0 }
 0x15d   : > { %v2920_v46 = vpack.c.bf16 %v1513_v41, %v1512_v39  ;;  %v2755_v47 = vpack.c.bf16 %v1447_v42, %v1446_v40  ;;  %v3127_v48 = vpop.f32.mrb[60].mxu0 }
 0x15e   : > { %2960 = vst [vmem:[%s3471_s27 + $0xe8] sm:$0xff] %v2760_v44   ;;  %v2915_v49 = vpack.c.bf16 %v1511_v45, %v1510_v43  ;;  %v1128_v50 = vadd.f32 %v3127_v48, %v3456_v6  ;;  %v3191_v51 = vpop.f32.mrb[60].mxu1  ;;  %v1119_v52 = vpop.f32.mrb[61].mxu0 }
 0x15f   : > { %2992 = vst [vmem:[%s3471_s27 + $0x1e8] sm:$0xff] %v2920_v46   ;;  %2959 = vst [vmem:[%s3471_s27 + $0xe0] sm:$0xff] %v2755_v47   ;;  %v1384_v53 = vadd.f32 %v3191_v51, %v3456_v6  ;;  %v1120_v54 = vadd.f32 %v3456_v6, %v1119_v52  ;;  %v1375_v55 = vpop.f32.mrb[61].mxu1  ;;  %v3128_v56 = vpop.f32.mrb[62].mxu0 }
 0x160   : > { %2991 = vst [vmem:[%s3471_s27 + $0x1e0] sm:$0xff] %v2915_v49   ;;  %v1376_v57 = vadd.f32 %v3456_v6, %v1375_v55  ;;  %v1131_v58 = vadd.f32 %v3128_v56, %v3456_v6  ;;  %v3192_v59 = vpop.f32.mrb[62].mxu1  ;;  %v1122_v60 = vpop.f32.mrb[63].mxu0  ;;  %v1452_v0 = vmax.f32 %v1128_v50, 0.0 }
 0x161   : > { %v1387_v61 = vadd.f32 %v3192_v59, %v3456_v6  ;;  %v1123_v62 = vadd.f32 %v3456_v6, %v1122_v60  ;;  %v1378_v63 = vpop.f32.mrb[63].mxu1  ;;  %v1516_v3 = vmax.f32 %v1384_v53, 0.0  ;;  %v1450_v4 = vmax.f32 %v1120_v54, 0.0 }
 0x162   : > { %v1453_v1 = vmax.f32 %v1131_v58, 0.0  ;;  %v1379_v2 = vadd.f32 %v3456_v6, %v1378_v63  ;;  %v1514_v8 = vmax.f32 %v1376_v57, 0.0 }
 0x163   : > { %v1517_v5 = vmax.f32 %v1387_v61, 0.0  ;;  %v1451_v7 = vmax.f32 %v1123_v62, 0.0 }
 0x164   : > { %v2770_v9 = vpack.c.bf16 %v1453_v1, %v1452_v0  ;;  %v1515_v10 = vmax.f32 %v1379_v2, 0.0 }
 0x165   : > { %v2930_v11 = vpack.c.bf16 %v1517_v5, %v1516_v3  ;;  %v2765_v12 = vpack.c.bf16 %v1451_v7, %v1450_v4 }
 0x166   : > { %2962 = vst [vmem:[%s3471_s27 + $0xf8] sm:$0xff] %v2770_v9   ;;  %v2925_v13 = vpack.c.bf16 %v1515_v10, %v1514_v8 }
 0x167   : > { %2994 = vst [vmem:[%s3471_s27 + $0x1f8] sm:$0xff] %v2930_v11   ;;  %2961 = vst [vmem:[%s3471_s27 + $0xf0] sm:$0xff] %v2765_v12  }
 0x168   : > { %2993 = vst [vmem:[%s3471_s27 + $0x1f0] sm:$0xff] %v2925_v13  }
 0x169 PF: > { %s13_s12 = sadd.s32 1, %s3278_s12  }
 0x16a   : > { %p10_p4 = scmp.ge.s32.totalorder %s13_s12, 4  }
 0x16c   :  { %12 = sbr.rel (!%p10_p4) target bundleno = 1 (0x1), region = 62 }

// kernel: head_sphere_guidance_forward.5
= control target key start
LH: loop header
LB: loop body
LE: loop exit
PB: predicated region body
PF: predicated region fallthrough
CT: control target
= control target key end

     0   :  { %s1293_s12 = smov 0   ;;  %s1479_s0 = inlined_call_operand.vmem [shape: bf16[256,432], index: 0, kind: input, shape index: {}]   ;;  %s1480_s1 = inlined_call_operand.vmem [shape: bf16[432,128], index: 1, kind: input, shape index: {}]   ;;  %s1481_s2 = inlined_call_operand.vmem [shape: f32[1,128], index: 2, kind: input, shape index: {}]   ;;  %s1482_s3 = inlined_call_operand.vmem [shape: bf16[256,128], index: 3, kind: output, shape index: {}]  }
   0x1 LB: > { %s956_s13 = sadd.s32 4294967295, %s1270_s12   ;;  %p960_p0 = scmp.ge.s32.totalorder %s1270_s12, 1  ;;  %s1270_s12 = sphi %s1293_s12, %s13_s12  }
   0x2   : > { %p139_p1 = scmp.lt.s32.totalorder %s1270_s12, 3 }
   0x4   : > { %p140_p2 = pnand %p960_p0, %p139_p1 }
   0x5   : > { %v1189_v0 = vld [vmem:[%s1480_s1 + $0x80] sm:$0xff] (!%p140_p2)   ;;  %v1272_v1 = vmov (!%p140_p2), 0   ;;  %v1192_v4 = vld [vmem:[%s1480_s1 + $0x88] sm:$0xff] (!%p140_p2)   ;;  %v1195_v7 = vld [vmem:[%s1480_s1 + $0x90] sm:$0xff] (!%p140_p2)   ;;  %s961_s7 = sshll.u32 (!%p140_p2), %s956_s13, 4  ;;  %vm585_vm0 = vcmask (!%p140_p2), 392192  }
   0x6   : > { %143 = sbr.rel (%p140_p2) target bundleno = 327 (0x147), region = 32  ;;  %707 = vmatprep.subr.bf16.mxu1 (!%p140_p2), %v1272_v1  ;;  %v1190_v2 = vld [vmem:[%s1480_s1 + $0x40] sm:$0xff] (!%p140_p2)   ;;  %v1193_v5 = vld [vmem:[%s1480_s1 + $0x48] sm:$0xff] (!%p140_p2)   ;;  %v1196_v8 = vld [vmem:[%s1480_s1 + $0x50] sm:$0xff] (!%p140_p2)   ;;  %p165_p3 = scmp.lt.s32.totalorder (!%p140_p2), %s961_s7, 31 }
   0x7   : > { %708 = vmatpush1.bf16.msra.mxu1 (!%p140_p2), %v1189_v0  ;;  %v1191_v3 = vld [vmem:[%s1480_s1] sm:$0xff] (!%p140_p2)   ;;  %1116 = vmatprep.subr.bf16.mxu0 (!%p140_p2), %v1190_v2  ;;  %v1194_v6 = vld [vmem:[%s1480_s1 + $0x8] sm:$0xff] (!%p140_p2)   ;;  %v1197_v9 = vld [vmem:[%s1480_s1 + $0x10] sm:$0xff] (!%p140_p2)  }
   0x8   : > { %709 = vmatprep.subr.bf16.mxu1 (!%p140_p2), %v1272_v1  ;;  %1117 = vmatpush3.bf16.msra.mxu0 (!%p140_p2), %v1191_v3  ;;  %v1198_v10 = vld [vmem:[%s1480_s1 + $0x98] sm:$0xff] (!%p140_p2)   ;;  %v1202_v13 = vld [vmem:[%s1480_s1 + $0x60] sm:$0xff] (!%p140_p2)   ;;  %v1205_v16 = vld [vmem:[%s1480_s1 + $0x68] sm:$0xff] (!%p140_p2)  }
   0x9   : > { %1118 = vmatprep.subr.bf16.mxu0 (!%p140_p2), %v1193_v5  ;;  %v1199_v11 = vld [vmem:[%s1480_s1 + $0x58] sm:$0xff] (!%p140_p2)   ;;  %v1201_v14 = vld [vmem:[%s1480_s1 + $0xa0] sm:$0xff] (!%p140_p2)   ;;  %v1204_v17 = vld [vmem:[%s1480_s1 + $0xa8] sm:$0xff] (!%p140_p2)  }
   0xa   : > { %v1200_v12 = vld [vmem:[%s1480_s1 + $0x18] sm:$0xff] (!%p140_p2)   ;;  %v1203_v15 = vld [vmem:[%s1480_s1 + $0x20] sm:$0xff] (!%p140_p2)   ;;  %v1206_v18 = vld [vmem:[%s1480_s1 + $0x28] sm:$0xff] (!%p140_p2)  }
   0xb   : > { %710 = vmatpush1.bf16.msra.mxu1 (!%p140_p2), %v1192_v4  ;;  %v1208_v19 = vld [vmem:[%s1480_s1 + $0x70] sm:$0xff] (!%p140_p2)   ;;  %v1210_v22 = vld [vmem:[%s1480_s1 + $0xb8] sm:$0xff] (!%p140_p2)   ;;  %v1213_v26 = vld [vmem:[%s1480_s1 + $0xc0] sm:$0xff] (!%p140_p2)  }
   0xc   : > { %711 = vmatprep.subr.bf16.mxu1 (!%p140_p2), %v1272_v1  ;;  %1119 = vmatpush3.bf16.msra.mxu0 (!%p140_p2), %v1194_v6  ;;  %v1207_v20 = vld [vmem:[%s1480_s1 + $0xb0] sm:$0xff] (!%p140_p2)   ;;  %v1211_v23 = vld [vmem:[%s1480_s1 + $0x78] sm:$0xff] (!%p140_p2)   ;;  %v1217_v30 = vld [vmem:[%s1480_s1 + $0xc8] sm:$0xff] (!%p140_p2)  }
   0xd   : > { %1120 = vmatprep.subr.bf16.mxu0 %v1196_v8  ;;  %s1484_s7 = smov (!%p165_p3, %s961_s7), 31  ;;  %v1209_v21 = vld [vmem:[%s1480_s1 + $0x30] sm:$0xff]   ;;  %v1212_v25 = vld [vmem:[%s1480_s1 + $0x38] sm:$0xff]   ;;  %v1444_v2 = vld [vmem:[%s1481_s2] ss:$0 sm:$0xff] }
   0xe   : > { %s1052_s25 = sshll.u32 %s1484_s7, 4  ;;  %v1218_v31 = vld [vmem:[%s1480_s1 + $0xd0] sm:$0xff]   ;;  %s965_s24 = sshll.u32 %s1484_s7, 2 }
   0xf   : > { %712 = vmatpush1.bf16.msra.mxu1 %v1195_v7  ;;  %s1377_s8 = scalar_lea.vmem %s1479_s0, %s1052_s25  ;;  %s1453_s27 = scalar_lea.vmem %s1482_s3, %s965_s24 }
  0x10   : > { %713 = vmatprep.subr.bf16.mxu1 %v1272_v1  ;;  %1121 = vmatpush3.bf16.msra.mxu0 %v1197_v9  ;;  %v1216_v24 = vld [vmem:[%s1377_s8 + $0x4] ss:$16 sps:$4 sm:$0xff]   ;;  %v1223_v27 = vld [vmem:[%s1377_s8 + $0xc] ss:$16 sps:$4 sm:$0xff]   ;;  %v1214_v28 = vld [vmem:[%s1377_s8] ss:$16 sps:$4 sm:$0xff]  }
  0x11   : > { %1122 = vmatprep.subr.bf16.mxu0 %v1199_v11  ;;  %642 = vmatprep.mubr.bf16.mxu0 %v1216_v24  ;;  %v1219_v29 = vld [vmem:[%s1377_s8 + $0x24] ss:$16 sps:$4 sm:$0xff]   ;;  %v1224_v32 = vld [vmem:[%s1377_s8 + $0x20] ss:$16 sps:$4 sm:$0xff]   ;;  %v1221_v34 = vld [vmem:[%s1377_s8 + $0x8] ss:$16 sps:$4 sm:$0xff]  }
  0x12   : > { %1026 = vmatprep.mubr.msk.bf16.mxu1 %vm585_vm0, %v1223_v27  ;;  %v1225_v33 = vld [vmem:[%s1377_s8 + $0x44] ss:$16 sps:$4 sm:$0xff]   ;;  %v1227_v35 = vld [vmem:[%s1377_s8 + $0x2c] ss:$16 sps:$4 sm:$0xff]   ;;  %v1229_v36 = vld [vmem:[%s1377_s8 + $0x40] ss:$16 sps:$4 sm:$0xff]  }
  0x13   : > { %714 = vmatpush1.bf16.msra.mxu1 %v1198_v10  ;;  %v1231_v37 = vld [vmem:[%s1377_s8 + $0x64] ss:$16 sps:$4 sm:$0xff]   ;;  %v1230_v38 = vld [vmem:[%s1377_s8 + $0x28] ss:$16 sps:$4 sm:$0xff]   ;;  %v1233_v39 = vld [vmem:[%s1377_s8 + $0x4c] ss:$16 sps:$4 sm:$0xff]  }
  0x14   : > { %715 = vmatprep.subr.bf16.mxu1 %v1272_v1  ;;  %1123 = vmatpush3.bf16.msra.mxu0 %v1200_v12  ;;  %v1235_v40 = vld [vmem:[%s1377_s8 + $0x60] ss:$16 sps:$4 sm:$0xff]   ;;  %v1237_v41 = vld [vmem:[%s1377_s8 + $0x84] ss:$16 sps:$4 sm:$0xff]   ;;  %v1236_v42 = vld [vmem:[%s1377_s8 + $0x48] ss:$16 sps:$4 sm:$0xff]  }
  0x15   : > { %1124 = vmatprep.subr.bf16.mxu0 %v1202_v13  ;;  %v1239_v43 = vld [vmem:[%s1377_s8 + $0x6c] ss:$16 sps:$4 sm:$0xff]   ;;  %v1241_v44 = vld [vmem:[%s1377_s8 + $0x80] ss:$16 sps:$4 sm:$0xff]   ;;  %v1243_v45 = vld [vmem:[%s1377_s8 + $0xa4] ss:$16 sps:$4 sm:$0xff]  }
  0x16   : > { %v1242_v46 = vld [vmem:[%s1377_s8 + $0x68] ss:$16 sps:$4 sm:$0xff]   ;;  %v1245_v47 = vld [vmem:[%s1377_s8 + $0x8c] ss:$16 sps:$4 sm:$0xff]   ;;  %v1247_v48 = vld [vmem:[%s1377_s8 + $0xa0] ss:$16 sps:$4 sm:$0xff]  }
  0x17   : > { %716 = vmatpush1.bf16.msra.mxu1 %v1201_v14  ;;  %v1249_v49 = vld [vmem:[%s1377_s8 + $0xc4] ss:$16 sps:$4 sm:$0xff]   ;;  %v1248_v50 = vld [vmem:[%s1377_s8 + $0x88] ss:$16 sps:$4 sm:$0xff]   ;;  %v1251_v51 = vld [vmem:[%s1377_s8 + $0xac] ss:$16 sps:$4 sm:$0xff]  }
  0x18   : > { %717 = vmatprep.subr.bf16.mxu1 %v1272_v1  ;;  %1125 = vmatpush3.bf16.msra.mxu0 %v1203_v15  ;;  %v1253_v52 = vld [vmem:[%s1377_s8 + $0xc0] ss:$16 sps:$4 sm:$0xff]   ;;  %v1255_v53 = vld [vmem:[%s1377_s8 + $0xe4] ss:$16 sps:$4 sm:$0xff]   ;;  %v1254_v54 = vld [vmem:[%s1377_s8 + $0xa8] ss:$16 sps:$4 sm:$0xff]  }
  0x19   : > { %1126 = vmatprep.subr.bf16.mxu0 %v1205_v16  ;;  %v1257_v55 = vld [vmem:[%s1377_s8 + $0xcc] ss:$16 sps:$4 sm:$0xff]   ;;  %v1259_v56 = vld [vmem:[%s1377_s8 + $0xe0] ss:$16 sps:$4 sm:$0xff]   ;;  %v1260_v57 = vld [vmem:[%s1377_s8 + $0xc8] ss:$16 sps:$4 sm:$0xff]  }
  0x1a   : > { %v1261_v58 = vld [vmem:[%s1377_s8 + $0xec] ss:$16 sps:$4 sm:$0xff]   ;;  %v1263_v59 = vld [vmem:[%s1377_s8 + $0xe8] ss:$16 sps:$4 sm:$0xff]  }
  0x1b   : > { %718 = vmatpush1.bf16.msra.mxu1 %v1204_v17 }
  0x1c   : > { %719 = vmatprep.subr.bf16.mxu1 %v1272_v1  ;;  %1127 = vmatpush3.bf16.msra.mxu0 %v1206_v18 }
  0x1d   : > { %1128 = vmatprep.subr.bf16.mxu0 %v1208_v19 }
  0x1f   : > { %720 = vmatpush1.bf16.msra.mxu1 %v1207_v20 }
  0x20   : > { %721 = vmatprep.subr.bf16.mxu1 %v1272_v1  ;;  %1129 = vmatpush3.bf16.msra.mxu0 %v1209_v21 }
  0x21   : > { %1130 = vmatprep.subr.bf16.mxu0 %v1211_v23 }
  0x23   : > { %722 = vmatpush1.bf16.msra.mxu1 %v1210_v22 }
  0x24   : > { %723 = vmatprep.subr.bf16.mxu1 %v1272_v1  ;;  %1131 = vmatpush3.bf16.msra.mxu0 %v1212_v25 }
  0x27   : > { %724 = vmatpush1.bf16.msra.mxu1 %v1213_v26  ;;  %643 = vmatmul.mubr.bf16.vlgmr.msra.gmra.mrb[0].mxu0 %v1214_v28 }
  0x28   : > { %725 = vmatprep.subr.bf16.mxu1 %v1272_v1  ;;  %650 = vmatprep.mubr.bf16.mxu0 %v1219_v29 }
  0x2b   : > { %726 = vmatpush1.bf16.msra.mxu1 %v1217_v30 }
  0x2c   : > { %727 = vmatprep.subr.bf16.mxu1 %v1272_v1 }
  0x2f   : > { %728 = vmatpush1.bf16.msra.mxu1 %v1218_v31  ;;  %651 = vmatmul.mubr.bf16.gmra.mrb[4].mxu0 %v1224_v32 }
  0x30   : > { %658 = vmatprep.mubr.bf16.mxu0 %v1225_v33 }
  0x32   : > { %740 = vmatmul.mubr.bf16.vlgmr.msra.gmra.mrb[0].mxu1 %v1221_v34 }
  0x33   : > { %1027 = vmatprep.mubr.msk.bf16.mxu1 %vm585_vm0, %v1227_v35 }
  0x37   : > { %659 = vmatmul.mubr.bf16.gmra.mrb[8].mxu0 %v1229_v36 }
  0x38   : > { %666 = vmatprep.mubr.bf16.mxu0 %v1231_v37 }
  0x3a   : > { %748 = vmatmul.mubr.bf16.gmra.mrb[4].mxu1 %v1230_v38 }
  0x3b   : > { %1028 = vmatprep.mubr.msk.bf16.mxu1 %vm585_vm0, %v1233_v39 }
  0x3f   : > { %667 = vmatmul.mubr.bf16.gmra.mrb[12].mxu0 %v1235_v40 }
  0x40   : > { %674 = vmatprep.mubr.bf16.mxu0 %v1237_v41 }
  0x42   : > { %756 = vmatmul.mubr.bf16.gmra.mrb[8].mxu1 %v1236_v42 }
  0x43   : > { %1029 = vmatprep.mubr.msk.bf16.mxu1 %vm585_vm0, %v1239_v43 }
  0x47   : > { %675 = vmatmul.mubr.bf16.gmra.mrb[16].mxu0 %v1241_v44 }
  0x48   : > { %682 = vmatprep.mubr.bf16.mxu0 %v1243_v45 }
  0x4a   : > { %764 = vmatmul.mubr.bf16.gmra.mrb[12].mxu1 %v1242_v46 }
  0x4b   : > { %1030 = vmatprep.mubr.msk.bf16.mxu1 %vm585_vm0, %v1245_v47 }
  0x4f   : > { %683 = vmatmul.mubr.bf16.gmra.mrb[20].mxu0 %v1247_v48 }
  0x50   : > { %690 = vmatprep.mubr.bf16.mxu0 %v1249_v49 }
  0x52   : > { %772 = vmatmul.mubr.bf16.gmra.mrb[16].mxu1 %v1248_v50 }
  0x53   : > { %1031 = vmatprep.mubr.msk.bf16.mxu1 %vm585_vm0, %v1251_v51 }
  0x57   : > { %691 = vmatmul.mubr.bf16.gmra.mrb[24].mxu0 %v1253_v52 }
  0x58   : > { %698 = vmatprep.mubr.bf16.mxu0 %v1255_v53 }
  0x5a   : > { %780 = vmatmul.mubr.bf16.gmra.mrb[20].mxu1 %v1254_v54 }
  0x5b   : > { %1032 = vmatprep.mubr.msk.bf16.mxu1 %vm585_vm0, %v1257_v55 }
  0x5f   : > { %699 = vmatmul.mubr.bf16.gmra.mrb[28].mxu0 %v1259_v56 }
  0x62   : > { %788 = vmatmul.mubr.bf16.gmra.mrb[24].mxu1 %v1260_v57 }
  0x63   : > { %1033 = vmatprep.mubr.msk.bf16.mxu1 %vm585_vm0, %v1261_v58 }
  0x6a   : > { %796 = vmatmul.mubr.bf16.gmra.mrb[28].mxu1 %v1263_v59 }
  0xfa   : > { %v1132_v60 = vpop.f32.mrb[0].mxu0 }
  0xfb   : > { %v1133_v61 = vpop.f32.mrb[1].mxu0 }
  0xfc   : > { %v1134_v62 = vadd.f32 %v1133_v61, %v1132_v60  ;;  %v1135_v63 = vpop.f32.mrb[2].mxu0 }
  0xfd   : > { %v1136_v0 = vpop.f32.mrb[3].mxu0 }
  0xfe   : > { %v1137_v1 = vadd.f32 %v1136_v0, %v1135_v63  ;;  %v645_v3 = vadd.f32 %v1134_v62, %v1444_v2 }
 0x100   : > { %v648_v11 = vadd.f32 %v1137_v1, %v1444_v2 }
 0x102   : > { %v1138_v4 = vpop.f32.mrb[4].mxu0 }
 0x103   : > { %v1139_v5 = vpop.f32.mrb[5].mxu0 }
 0x104   : > { %v1140_v7 = vadd.f32 %v1139_v5, %v1138_v4  ;;  %v1141_v8 = vpop.f32.mrb[6].mxu0 }
 0x105   : > { %v741_v6 = vpop.f32.mrb[0].mxu1  ;;  %v1142_v12 = vpop.f32.mrb[7].mxu0 }
 0x106   : > { %v742_v9 = vadd.f32 %v741_v6, %v645_v3  ;;  %v743_v10 = vpop.f32.mrb[1].mxu1  ;;  %v1143_v14 = vadd.f32 %v1142_v12, %v1141_v8  ;;  %v653_v19 = vadd.f32 %v1140_v7, %v1444_v2 }
 0x107   : > { %v744_v13 = vpop.f32.mrb[2].mxu1 }
 0x108   : > { %v745_v15 = vadd.f32 %v744_v13, %v648_v11  ;;  %v746_v16 = vpop.f32.mrb[3].mxu1  ;;  %v804_v17 = vmax.f32 %v742_v9, 0.0  ;;  %v656_v28 = vadd.f32 %v1143_v14, %v1444_v2 }
 0x10a   : > { %v805_v18 = vmax.f32 %v745_v15, 0.0  ;;  %v1144_v20 = vpop.f32.mrb[8].mxu0 }
 0x10b   : > { %v1145_v22 = vpop.f32.mrb[9].mxu0 }
 0x10c   : > { %v1072_v21 = vpack.c.bf16 %v805_v18, %v804_v17  ;;  %v1146_v24 = vadd.f32 %v1145_v22, %v1144_v20  ;;  %v1147_v25 = vpop.f32.mrb[10].mxu0 }
 0x10d   : > { %v749_v23 = vpop.f32.mrb[4].mxu1  ;;  %v1148_v29 = vpop.f32.mrb[11].mxu0 }
 0x10e   : > { %1073 = vst [vmem:[%s1453_s27] sm:$0xff] %v1072_v21   ;;  %v750_v26 = vadd.f32 %v749_v23, %v653_v19  ;;  %v751_v27 = vpop.f32.mrb[5].mxu1  ;;  %v1149_v31 = vadd.f32 %v1148_v29, %v1147_v25  ;;  %v661_v36 = vadd.f32 %v1146_v24, %v1444_v2 }
 0x10f   : > { %v752_v30 = vpop.f32.mrb[6].mxu1 }
 0x110   : > { %v753_v32 = vadd.f32 %v752_v30, %v656_v28  ;;  %v754_v33 = vpop.f32.mrb[7].mxu1  ;;  %v806_v34 = vmax.f32 %v750_v26, 0.0  ;;  %v664_v45 = vadd.f32 %v1149_v31, %v1444_v2 }
 0x112   : > { %v807_v35 = vmax.f32 %v753_v32, 0.0  ;;  %v1150_v37 = vpop.f32.mrb[12].mxu0 }
 0x113   : > { %v1151_v39 = vpop.f32.mrb[13].mxu0 }
 0x114   : > { %v1077_v38 = vpack.c.bf16 %v807_v35, %v806_v34  ;;  %v1152_v41 = vadd.f32 %v1151_v39, %v1150_v37  ;;  %v1153_v42 = vpop.f32.mrb[14].mxu0 }
 0x115   : > { %v757_v40 = vpop.f32.mrb[8].mxu1  ;;  %v1154_v46 = vpop.f32.mrb[15].mxu0 }
 0x116   : > { %1109 = vst [vmem:[%s1453_s27 + $0x8] sm:$0xff] %v1077_v38   ;;  %v758_v43 = vadd.f32 %v757_v40, %v661_v36  ;;  %v759_v44 = vpop.f32.mrb[9].mxu1  ;;  %v1155_v48 = vadd.f32 %v1154_v46, %v1153_v42  ;;  %v669_v53 = vadd.f32 %v1152_v41, %v1444_v2 }
 0x117   : > { %v760_v47 = vpop.f32.mrb[10].mxu1 }
 0x118   : > { %v761_v49 = vadd.f32 %v760_v47, %v664_v45  ;;  %v762_v50 = vpop.f32.mrb[11].mxu1  ;;  %v808_v51 = vmax.f32 %v758_v43, 0.0  ;;  %v672_v62 = vadd.f32 %v1155_v48, %v1444_v2 }
 0x11a   : > { %v809_v52 = vmax.f32 %v761_v49, 0.0  ;;  %v1156_v54 = vpop.f32.mrb[16].mxu0 }
 0x11b   : > { %v1157_v56 = vpop.f32.mrb[17].mxu0 }
 0x11c   : > { %v1082_v55 = vpack.c.bf16 %v809_v52, %v808_v51  ;;  %v1158_v58 = vadd.f32 %v1157_v56, %v1156_v54  ;;  %v1159_v59 = vpop.f32.mrb[18].mxu0 }
 0x11d   : > { %v765_v57 = vpop.f32.mrb[12].mxu1  ;;  %v1160_v63 = vpop.f32.mrb[19].mxu0 }
 0x11e   : > { %1110 = vst [vmem:[%s1453_s27 + $0x10] sm:$0xff] %v1082_v55   ;;  %v766_v60 = vadd.f32 %v765_v57, %v669_v53  ;;  %v767_v61 = vpop.f32.mrb[13].mxu1  ;;  %v1161_v1 = vadd.f32 %v1160_v63, %v1159_v59  ;;  %v677_v7 = vadd.f32 %v1158_v58, %v1444_v2 }
 0x11f   : > { %v768_v0 = vpop.f32.mrb[14].mxu1 }
 0x120   : > { %v769_v3 = vadd.f32 %v768_v0, %v672_v62  ;;  %v770_v4 = vpop.f32.mrb[15].mxu1  ;;  %v810_v5 = vmax.f32 %v766_v60, 0.0  ;;  %v680_v16 = vadd.f32 %v1161_v1, %v1444_v2 }
 0x122   : > { %v811_v6 = vmax.f32 %v769_v3, 0.0  ;;  %v1162_v8 = vpop.f32.mrb[20].mxu0 }
 0x123   : > { %v1163_v10 = vpop.f32.mrb[21].mxu0 }
 0x124   : > { %v1087_v9 = vpack.c.bf16 %v811_v6, %v810_v5  ;;  %v1164_v12 = vadd.f32 %v1163_v10, %v1162_v8  ;;  %v1165_v13 = vpop.f32.mrb[22].mxu0 }
 0x125   : > { %v773_v11 = vpop.f32.mrb[16].mxu1  ;;  %v1166_v17 = vpop.f32.mrb[23].mxu0 }
 0x126   : > { %1111 = vst [vmem:[%s1453_s27 + $0x18] sm:$0xff] %v1087_v9   ;;  %v774_v14 = vadd.f32 %v773_v11, %v677_v7  ;;  %v775_v15 = vpop.f32.mrb[17].mxu1  ;;  %v1167_v19 = vadd.f32 %v1166_v17, %v1165_v13  ;;  %v685_v24 = vadd.f32 %v1164_v12, %v1444_v2 }
 0x127   : > { %v776_v18 = vpop.f32.mrb[18].mxu1 }
 0x128   : > { %v777_v20 = vadd.f32 %v776_v18, %v680_v16  ;;  %v778_v21 = vpop.f32.mrb[19].mxu1  ;;  %v812_v22 = vmax.f32 %v774_v14, 0.0  ;;  %v688_v33 = vadd.f32 %v1167_v19, %v1444_v2 }
 0x12a   : > { %v813_v23 = vmax.f32 %v777_v20, 0.0  ;;  %v1168_v25 = vpop.f32.mrb[24].mxu0 }
 0x12b   : > { %v1169_v27 = vpop.f32.mrb[25].mxu0 }
 0x12c   : > { %v1092_v26 = vpack.c.bf16 %v813_v23, %v812_v22  ;;  %v1170_v29 = vadd.f32 %v1169_v27, %v1168_v25  ;;  %v1171_v30 = vpop.f32.mrb[26].mxu0 }
 0x12d   : > { %v781_v28 = vpop.f32.mrb[20].mxu1  ;;  %v1172_v34 = vpop.f32.mrb[27].mxu0 }
 0x12e   : > { %1112 = vst [vmem:[%s1453_s27 + $0x20] sm:$0xff] %v1092_v26   ;;  %v782_v31 = vadd.f32 %v781_v28, %v685_v24  ;;  %v783_v32 = vpop.f32.mrb[21].mxu1  ;;  %v1173_v36 = vadd.f32 %v1172_v34, %v1171_v30  ;;  %v693_v41 = vadd.f32 %v1170_v29, %v1444_v2 }
 0x12f   : > { %v784_v35 = vpop.f32.mrb[22].mxu1 }
 0x130   : > { %v785_v37 = vadd.f32 %v784_v35, %v688_v33  ;;  %v786_v38 = vpop.f32.mrb[23].mxu1  ;;  %v814_v39 = vmax.f32 %v782_v31, 0.0  ;;  %v696_v50 = vadd.f32 %v1173_v36, %v1444_v2 }
 0x132   : > { %v815_v40 = vmax.f32 %v785_v37, 0.0  ;;  %v1174_v42 = vpop.f32.mrb[28].mxu0 }
 0x133   : > { %v1175_v44 = vpop.f32.mrb[29].mxu0 }
 0x134   : > { %v1097_v43 = vpack.c.bf16 %v815_v40, %v814_v39  ;;  %v1176_v46 = vadd.f32 %v1175_v44, %v1174_v42  ;;  %v1177_v47 = vpop.f32.mrb[30].mxu0 }
 0x135   : > { %v789_v45 = vpop.f32.mrb[24].mxu1  ;;  %v1178_v51 = vpop.f32.mrb[31].mxu0 }
 0x136   : > { %1113 = vst [vmem:[%s1453_s27 + $0x28] sm:$0xff] %v1097_v43   ;;  %v790_v48 = vadd.f32 %v789_v45, %v693_v41  ;;  %v791_v49 = vpop.f32.mrb[25].mxu1  ;;  %v1179_v53 = vadd.f32 %v1178_v51, %v1177_v47  ;;  %v701_v58 = vadd.f32 %v1176_v46, %v1444_v2 }
 0x137   : > { %v792_v52 = vpop.f32.mrb[26].mxu1 }
 0x138   : > { %v793_v54 = vadd.f32 %v792_v52, %v696_v50  ;;  %v794_v55 = vpop.f32.mrb[27].mxu1  ;;  %v816_v56 = vmax.f32 %v790_v48, 0.0  ;;  %v704_v63 = vadd.f32 %v1179_v53, %v1444_v2 }
 0x13a   : > { %v817_v57 = vmax.f32 %v793_v54, 0.0 }
 0x13c   : > { %v1102_v59 = vpack.c.bf16 %v817_v57, %v816_v56 }
 0x13d   : > { %v797_v60 = vpop.f32.mrb[28].mxu1 }
 0x13e   : > { %1114 = vst [vmem:[%s1453_s27 + $0x30] sm:$0xff] %v1102_v59   ;;  %v798_v61 = vadd.f32 %v797_v60, %v701_v58  ;;  %v799_v62 = vpop.f32.mrb[29].mxu1 }
 0x13f   : > { %v800_v0 = vpop.f32.mrb[30].mxu1 }
 0x140   : > { %v801_v1 = vadd.f32 %v800_v0, %v704_v63  ;;  %v802_v3 = vpop.f32.mrb[31].mxu1  ;;  %v818_v4 = vmax.f32 %v798_v61, 0.0 }
 0x142   : > { %v819_v5 = vmax.f32 %v801_v1, 0.0 }
 0x144   : > { %v1107_v6 = vpack.c.bf16 %v819_v5, %v818_v4 }
 0x146   : > { %1115 = vst [vmem:[%s1453_s27 + $0x38] sm:$0xff] %v1107_v6  }
 0x147 PF: > { %s13_s12 = sadd.s32 1, %s1270_s12  }
 0x148   : > { %p10_p4 = scmp.ge.s32.totalorder %s13_s12, 4  }
 0x14a   :  { %12 = sbr.rel (!%p10_p4) target bundleno = 1 (0x1), region = 62 }

// kernel: head_sphere_guidance_forward.6
= control target key start
LH: loop header
LB: loop body
LE: loop exit
PB: predicated region body
PF: predicated region fallthrough
CT: control target
= control target key end

     0   :  { %vm540_vm0 = vcmask 785408   ;;  %s1276_s1 = inlined_call_operand.vmem [shape: bf16[864,128], index: 1, kind: input, shape index: {}]   ;;  %s1277_s0 = inlined_call_operand.vmem [shape: bf16[32,864], index: 0, kind: input, shape index: {}]   ;;  %s1278_s2 = inlined_call_operand.vmem [shape: f32[1,128], index: 2, kind: input, shape index: {}]   ;;  %s1279_s3 = inlined_call_operand.vmem [shape: bf16[32,128], index: 3, kind: output, shape index: {}]  }
   0x1   :  { %v969_v0 = vld [vmem:[%s1276_s1 + $0x40] sm:$0xff]   ;;  %v973_v4 = vld [vmem:[%s1276_s1 + $0x48] sm:$0xff]   ;;  %v977_v8 = vld [vmem:[%s1276_s1 + $0x50] sm:$0xff]  }
   0x2   :  { %v970_v1 = vld [vmem:[%s1276_s1] sm:$0xff]   ;;  %861 = vmatprep.subr.bf16.mxu0 %v969_v0  ;;  %v974_v5 = vld [vmem:[%s1276_s1 + $0x8] sm:$0xff]   ;;  %v978_v9 = vld [vmem:[%s1276_s1 + $0x10] sm:$0xff]  }
   0x3   :  { %v971_v2 = vld [vmem:[%s1276_s1 + $0xc0] sm:$0xff]   ;;  %862 = vmatpush3.bf16.msra.mxu0 %v970_v1  ;;  %v975_v6 = vld [vmem:[%s1276_s1 + $0xc8] sm:$0xff]   ;;  %v979_v10 = vld [vmem:[%s1276_s1 + $0xd0] sm:$0xff]  }
   0x4   :  { %v972_v3 = vld [vmem:[%s1276_s1 + $0x80] sm:$0xff]   ;;  %889 = vmatprep.subr.bf16.mxu1 %v971_v2  ;;  %863 = vmatprep.subr.bf16.mxu0 %v973_v4  ;;  %v976_v7 = vld [vmem:[%s1276_s1 + $0x88] sm:$0xff]   ;;  %v980_v11 = vld [vmem:[%s1276_s1 + $0x90] sm:$0xff]  }
   0x5   :  { %890 = vmatpush3.bf16.msra.mxu1 %v972_v3  ;;  %v981_v12 = vld [vmem:[%s1276_s1 + $0x58] sm:$0xff]   ;;  %v985_v16 = vld [vmem:[%s1276_s1 + $0x60] sm:$0xff]   ;;  %v989_v20 = vld [vmem:[%s1276_s1 + $0x68] sm:$0xff]  }
   0x6   :  { %891 = vmatprep.subr.bf16.mxu1 %v975_v6  ;;  %v982_v13 = vld [vmem:[%s1276_s1 + $0x18] sm:$0xff]   ;;  %v986_v17 = vld [vmem:[%s1276_s1 + $0x20] sm:$0xff]   ;;  %v990_v21 = vld [vmem:[%s1276_s1 + $0x28] sm:$0xff]  }
   0x7   :  { %864 = vmatpush3.bf16.msra.mxu0 %v974_v5  ;;  %v983_v14 = vld [vmem:[%s1276_s1 + $0xd8] sm:$0xff]   ;;  %v987_v18 = vld [vmem:[%s1276_s1 + $0xe0] sm:$0xff]   ;;  %v991_v22 = vld [vmem:[%s1276_s1 + $0xe8] sm:$0xff]  }
   0x8   :  { %865 = vmatprep.subr.bf16.mxu0 %v977_v8  ;;  %v984_v15 = vld [vmem:[%s1276_s1 + $0x98] sm:$0xff]   ;;  %v988_v19 = vld [vmem:[%s1276_s1 + $0xa0] sm:$0xff]   ;;  %v992_v23 = vld [vmem:[%s1276_s1 + $0xa8] sm:$0xff]  }
   0x9   :  { %892 = vmatpush3.bf16.msra.mxu1 %v976_v7  ;;  %v993_v24 = vld [vmem:[%s1276_s1 + $0x70] sm:$0xff]   ;;  %v997_v28 = vld [vmem:[%s1276_s1 + $0x78] sm:$0xff]   ;;  %v1002_v32 = vld [vmem:[%s1277_s0 + $0x4] ss:$28 sps:$4 sm:$0xff]  }
   0xa   :  { %893 = vmatprep.subr.bf16.mxu1 %v979_v10  ;;  %v994_v25 = vld [vmem:[%s1276_s1 + $0x30] sm:$0xff]   ;;  %v998_v29 = vld [vmem:[%s1276_s1 + $0x38] sm:$0xff]   ;;  %579 = vmatprep.mubr.bf16.mxu0 %v1002_v32  ;;  %v1004_v34 = vld [vmem:[%s1276_s1 + $0x140] sm:$0xff]  }
   0xb   :  { %866 = vmatpush3.bf16.msra.mxu0 %v978_v9  ;;  %v995_v26 = vld [vmem:[%s1276_s1 + $0xf0] sm:$0xff]   ;;  %v999_v30 = vld [vmem:[%s1276_s1 + $0xf8] sm:$0xff]   ;;  %v1005_v35 = vld [vmem:[%s1277_s0 + $0x8] ss:$28 sps:$4 sm:$0xff]  }
   0xc   :  { %867 = vmatprep.subr.bf16.mxu0 %v981_v12  ;;  %v996_v27 = vld [vmem:[%s1276_s1 + $0xb0] sm:$0xff]   ;;  %v1000_v31 = vld [vmem:[%s1277_s0] ss:$28 sps:$4 sm:$0xff]   ;;  %v1007_v36 = vld [vmem:[%s1277_s0 + $0xc] ss:$28 sps:$4 sm:$0xff]  }
   0xd   :  { %894 = vmatpush3.bf16.msra.mxu1 %v980_v11  ;;  %v1003_v33 = vld [vmem:[%s1276_s1 + $0xb8] sm:$0xff]   ;;  %v1008_v37 = vld [vmem:[%s1276_s1 + $0x100] sm:$0xff]   ;;  %628 = vmatprep.mubr.bf16.mxu1 %v1007_v36  ;;  %v1009_v38 = vld [vmem:[%s1276_s1 + $0x148] sm:$0xff]  }
   0xe   :  { %895 = vmatprep.subr.bf16.mxu1 %v983_v14  ;;  %v1010_v39 = vld [vmem:[%s1276_s1 + $0x108] sm:$0xff]   ;;  %v1011_v40 = vld [vmem:[%s1276_s1 + $0x150] sm:$0xff]   ;;  %v1014_v42 = vld [vmem:[%s1276_s1 + $0x180] sm:$0xff]  }
   0xf   :  { %868 = vmatpush3.bf16.msra.mxu0 %v982_v13  ;;  %v1012_v41 = vld [vmem:[%s1276_s1 + $0x110] sm:$0xff]   ;;  %v1013_v43 = vld [vmem:[%s1276_s1 + $0x158] sm:$0xff]   ;;  %v1017_v45 = vld [vmem:[%s1276_s1 + $0x188] sm:$0xff]  }
  0x10   :  { %869 = vmatprep.subr.bf16.mxu0 %v985_v16  ;;  %v1015_v44 = vld [vmem:[%s1276_s1 + $0x118] sm:$0xff]   ;;  %v1016_v46 = vld [vmem:[%s1276_s1 + $0x160] sm:$0xff]   ;;  %v1022_v49 = vld [vmem:[%s1276_s1 + $0x190] sm:$0xff]  }
  0x11   :  { %896 = vmatpush3.bf16.msra.mxu1 %v984_v15  ;;  %v1019_v47 = vld [vmem:[%s1277_s0 + $0x3c] ss:$28 sps:$4 sm:$0xff]   ;;  %v1018_v48 = vld [vmem:[%s1276_s1 + $0x120] sm:$0xff]   ;;  %v1021_v51 = vld [vmem:[%s1276_s1 + $0x168] sm:$0xff]  }
  0x12   :  { %897 = vmatprep.subr.bf16.mxu1 %v987_v18  ;;  %v1023_v50 = vld [vmem:[%s1277_s0 + $0x38] ss:$28 sps:$4 sm:$0xff]   ;;  %v1025_v52 = vld [vmem:[%s1277_s0 + $0x44] ss:$28 sps:$4 sm:$0xff]   ;;  %v1024_v54 = vld [vmem:[%s1276_s1 + $0x128] sm:$0xff]  }
  0x13   :  { %870 = vmatpush3.bf16.msra.mxu0 %v986_v17  ;;  %v1027_v53 = vld [vmem:[%s1277_s0 + $0x40] ss:$28 sps:$4 sm:$0xff]   ;;  %v1028_v56 = vld [vmem:[%s1276_s1 + $0x170] sm:$0xff]   ;;  %v1037_v61 = vld [vmem:[%s1276_s1 + $0x1a8] sm:$0xff]  }
  0x14   :  { %871 = vmatprep.subr.bf16.mxu0 %v989_v20  ;;  %v1029_v55 = vld [vmem:[%s1276_s1 + $0x198] sm:$0xff]   ;;  %v1032_v57 = vld [vmem:[%s1276_s1 + $0x1a0] sm:$0xff]   ;;  %v1030_v58 = vld [vmem:[%s1276_s1 + $0x130] sm:$0xff]  }
  0x15   :  { %898 = vmatpush3.bf16.msra.mxu1 %v988_v19  ;;  %v1031_v59 = vld [vmem:[%s1276_s1 + $0x178] sm:$0xff]   ;;  %v1036_v60 = vld [vmem:[%s1277_s0 + $0x14] ss:$28 sps:$4 sm:$0xff]   ;;  %v1040_v2 = vld [vmem:[%s1277_s0 + $0x4c] ss:$28 sps:$4 sm:$0xff]  }
  0x16   :  { %899 = vmatprep.subr.bf16.mxu1 %v991_v22  ;;  %v1038_v62 = vld [vmem:[%s1277_s0 + $0x18] ss:$28 sps:$4 sm:$0xff]   ;;  %v1039_v0 = vld [vmem:[%s1277_s0 + $0x50] ss:$28 sps:$4 sm:$0xff]   ;;  %v1042_v3 = vld [vmem:[%s1277_s0 + $0x48] ss:$28 sps:$4 sm:$0xff]  }
  0x17   :  { %872 = vmatpush3.bf16.msra.mxu0 %v990_v21  ;;  %v1033_v63 = vld [vmem:[%s1276_s1 + $0x138] sm:$0xff]   ;;  %v1034_v1 = vld [vmem:[%s1277_s0 + $0x10] ss:$28 sps:$4 sm:$0xff]   ;;  %v771_v5 = vld [vmem:[%s1278_s2] ss:$0 sm:$0xff] }
  0x18   :  { %873 = vmatprep.subr.bf16.mxu0 %v993_v24 }
  0x19   :  { %900 = vmatpush3.bf16.msra.mxu1 %v992_v23 }
  0x1a   :  { %901 = vmatprep.subr.bf16.mxu1 %v995_v26 }
  0x1b   :  { %874 = vmatpush3.bf16.msra.mxu0 %v994_v25 }
  0x1c   :  { %875 = vmatprep.subr.bf16.mxu0 %v997_v28 }
  0x1d   :  { %902 = vmatpush3.bf16.msra.mxu1 %v996_v27 }
  0x1e   :  { %903 = vmatprep.subr.bf16.mxu1 %v999_v30 }
  0x1f   :  { %876 = vmatpush3.bf16.msra.mxu0 %v998_v29 }
  0x20   :  { %917 = vmatprep.subr.bf16.mxu0 %v1004_v34 }
  0x21   :  { %904 = vmatpush3.bf16.msra.mxu1 %v1003_v33 }
  0x22   :  { %580 = vmatmul.mubr.bf16.vlgmr.msra.gmra.mrb[0].mxu0 %v1000_v31  ;;  %953 = vmatprep.subr.bf16.mxu1 %v1014_v42 }
  0x23   :  { %918 = vmatpush3.bf16.msra.mxu0 %v1008_v37  ;;  %587 = vmatprep.mubr.bf16.mxu0 %v1019_v47 }
  0x24   :  { %629 = vmatmul.mubr.bf16.vlgmr.msra.gmra.mrb[0].mxu1 %v1005_v35  ;;  %919 = vmatprep.subr.bf16.mxu0 %v1009_v38 }
  0x25   :  { %954 = vmatpush3.bf16.msra.mxu1 %v1014_v42  ;;  %636 = vmatprep.mubr.bf16.mxu1 %v1025_v52 }
  0x26   :  { %955 = vmatprep.subr.bf16.mxu1 %v1017_v45 }
  0x27   :  { %920 = vmatpush3.bf16.msra.mxu0 %v1010_v39 }
  0x28   :  { %921 = vmatprep.subr.bf16.mxu0 %v1011_v40 }
  0x29   :  { %956 = vmatpush3.bf16.msra.mxu1 %v1017_v45 }
  0x2a   :  { %957 = vmatprep.subr.bf16.mxu1 %v1022_v49  ;;  %588 = vmatmul.mubr.bf16.gmra.mrb[4].mxu0 %v1023_v50 }
  0x2b   :  { %922 = vmatpush3.bf16.msra.mxu0 %v1012_v41  ;;  %677 = vmatprep.mubr.bf16.mxu0 %v1036_v60 }
  0x2c   :  { %923 = vmatprep.subr.bf16.mxu0 %v1013_v43  ;;  %637 = vmatmul.mubr.bf16.gmra.mrb[4].mxu1 %v1027_v53 }
  0x2d   :  { %958 = vmatpush3.bf16.msra.mxu1 %v1022_v49  ;;  %965 = vmatprep.mubr.msk.bf16.mxu1 %vm540_vm0, %v1038_v62 }
  0x2e   :  { %959 = vmatprep.subr.bf16.mxu1 %v1029_v55 }
  0x2f   :  { %924 = vmatpush3.bf16.msra.mxu0 %v1015_v44 }
  0x30   :  { %925 = vmatprep.subr.bf16.mxu0 %v1016_v46 }
  0x31   :  { %960 = vmatpush3.bf16.msra.mxu1 %v1029_v55 }
  0x32   :  { %961 = vmatprep.subr.bf16.mxu1 %v1032_v57 }
  0x33   :  { %926 = vmatpush3.bf16.msra.mxu0 %v1018_v48 }
  0x34   :  { %927 = vmatprep.subr.bf16.mxu0 %v1021_v51 }
  0x35   :  { %962 = vmatpush3.bf16.msra.mxu1 %v1032_v57 }
  0x36   :  { %963 = vmatprep.subr.bf16.mxu1 %v1037_v61 }
  0x37   :  { %928 = vmatpush3.bf16.msra.mxu0 %v1024_v54 }
  0x38   :  { %929 = vmatprep.subr.bf16.mxu0 %v1028_v56 }
  0x39   :  { %964 = vmatpush3.bf16.msra.mxu1 %v1037_v61 }
  0x3b   :  { %930 = vmatpush3.bf16.msra.mxu0 %v1030_v58 }
  0x3c   :  { %931 = vmatprep.subr.bf16.mxu0 %v1031_v59  ;;  %966 = vmatmul.mubr.msk.bf16.vlgmr.msra.gmra.mrb[8].mxu1 %vm540_vm0, %v1039_v0 }
  0x3f   :  { %932 = vmatpush3.bf16.msra.mxu0 %v1033_v63 }
  0x42   :  { %678 = vmatmul.mubr.bf16.vlgmr.msra.gmra.mrb[8].mxu0 %v1034_v1 }
  0x43   :  { %685 = vmatprep.mubr.bf16.mxu0 %v1040_v2 }
  0x4a   :  { %686 = vmatmul.mubr.bf16.gmra.mrb[12].mxu0 %v1042_v3 }
  0xf5   :  { %v877_v4 = vpop.f32.mrb[0].mxu0 }
  0xf6   :  { %v878_v6 = vpop.f32.mrb[1].mxu0 }
  0xf7   :  { %v879_v7 = vadd.f32 %v878_v6, %v877_v4  ;;  %v880_v8 = vpop.f32.mrb[2].mxu0  ;;  %v905_v9 = vpop.f32.mrb[0].mxu1 }
  0xf8   :  { %v881_v10 = vpop.f32.mrb[3].mxu0  ;;  %v906_v13 = vpop.f32.mrb[1].mxu1 }
  0xf9   :  { %v582_v11 = vadd.f32 %v879_v7, %v771_v5  ;;  %v882_v12 = vadd.f32 %v881_v10, %v880_v8  ;;  %v907_v14 = vadd.f32 %v906_v13, %v905_v9  ;;  %v908_v15 = vpop.f32.mrb[2].mxu1 }
  0xfa   :  { %v909_v17 = vpop.f32.mrb[3].mxu1 }
  0xfb   :  { %v585_v16 = vadd.f32 %v882_v12, %v771_v5  ;;  %v631_v18 = vadd.f32 %v907_v14, %v582_v11  ;;  %v910_v19 = vadd.f32 %v909_v17, %v908_v15 }
  0xfd   :  { %v634_v20 = vadd.f32 %v910_v19, %v585_v16  ;;  %v883_v21 = vpop.f32.mrb[4].mxu0 }
  0xfe   :  { %v884_v22 = vpop.f32.mrb[5].mxu0 }
  0xff   :  { %v885_v23 = vadd.f32 %v884_v22, %v883_v21  ;;  %v886_v24 = vpop.f32.mrb[6].mxu0  ;;  %v911_v25 = vpop.f32.mrb[4].mxu1 }
 0x100   :  { %v887_v26 = vpop.f32.mrb[7].mxu0  ;;  %v912_v27 = vpop.f32.mrb[5].mxu1 }
 0x101   :  { %v590_v28 = vadd.f32 %v885_v23, %v771_v5  ;;  %v888_v29 = vadd.f32 %v887_v26, %v886_v24  ;;  %v913_v30 = vadd.f32 %v912_v27, %v911_v25  ;;  %v914_v31 = vpop.f32.mrb[6].mxu1 }
 0x102   :  { %v915_v32 = vpop.f32.mrb[7].mxu1 }
 0x103   :  { %v593_v33 = vadd.f32 %v888_v29, %v771_v5  ;;  %v639_v34 = vadd.f32 %v913_v30, %v590_v28  ;;  %v916_v35 = vadd.f32 %v915_v32, %v914_v31 }
 0x105   :  { %v642_v36 = vadd.f32 %v916_v35, %v593_v33 }
 0x10f   :  { %v967_v37 = vpop.f32.mrb[8].mxu1 }
 0x110   :  { %v728_v39 = vpop.f32.mrb[9].mxu1 }
 0x111   :  { %v968_v41 = vpop.f32.mrb[10].mxu1 }
 0x112   :  { %v731_v44 = vpop.f32.mrb[11].mxu1 }
 0x115   :  { %v933_v38 = vpop.f32.mrb[8].mxu0 }
 0x116   :  { %v934_v40 = vpop.f32.mrb[9].mxu0 }
 0x117   :  { %v935_v42 = vadd.f32 %v934_v40, %v933_v38  ;;  %v936_v43 = vpop.f32.mrb[10].mxu0 }
 0x118   :  { %v937_v45 = vpop.f32.mrb[11].mxu0 }
 0x119   :  { %v938_v46 = vadd.f32 %v937_v45, %v936_v43  ;;  %v680_v47 = vadd.f32 %v935_v42, %v631_v18 }
 0x11b   :  { %v729_v48 = vadd.f32 %v728_v39, %v680_v47  ;;  %v683_v49 = vadd.f32 %v938_v46, %v634_v20 }
 0x11d   :  { %v732_v50 = vadd.f32 %v731_v44, %v683_v49  ;;  %v939_v51 = vpop.f32.mrb[12].mxu0  ;;  %v743_v53 = vmax.f32 %v729_v48, 0.0 }
 0x11e   :  { %v940_v52 = vpop.f32.mrb[13].mxu0 }
 0x11f   :  { %v744_v54 = vmax.f32 %v732_v50, 0.0  ;;  %v941_v55 = vadd.f32 %v940_v52, %v939_v51  ;;  %v942_v56 = vpop.f32.mrb[14].mxu0 }
 0x120   :  { %v943_v57 = vpop.f32.mrb[15].mxu0 }
 0x121   :  { %v853_v58 = vpack.c.bf16 %v744_v54, %v743_v53  ;;  %v688_v59 = vadd.f32 %v941_v55, %v639_v34  ;;  %v944_v60 = vadd.f32 %v943_v57, %v942_v56 }
 0x123   :  { %854 = vst [vmem:[%s1279_s3] sm:$0xff] %v853_v58   ;;  %v737_v61 = vadd.f32 %v967_v37, %v688_v59  ;;  %v691_v62 = vadd.f32 %v944_v60, %v642_v36 }
 0x125   :  { %v740_v63 = vadd.f32 %v968_v41, %v691_v62  ;;  %v745_v0 = vmax.f32 %v737_v61, 0.0 }
 0x127   :  { %v746_v1 = vmax.f32 %v740_v63, 0.0 }
 0x129   :  { %v858_v2 = vpack.c.bf16 %v746_v1, %v745_v0 }
 0x12b   :  { %860 = vst [vmem:[%s1279_s3 + $0x8] sm:$0xff] %v858_v2  }

// kernel: head_sphere_guidance_forward.7
= control target key start
LH: loop header
LB: loop body
LE: loop exit
PB: predicated region body
PF: predicated region fallthrough
CT: control target
= control target key end

     0   :  { %v266_v27 = vlaneseq  ;;  %v2023_v35 = vmov 1983009808   ;;  %vm982_vm0 = vcmask 523264   ;;  %s2498_s0 = inlined_call_operand.vmem [shape: bf16[4,1728], index: 0, kind: input, shape index: {}]   ;;  %s2499_s1 = inlined_call_operand.vmem [shape: bf16[1728,128], index: 1, kind: input, shape index: {}]   ;;  %s2500_s2 = inlined_call_operand.vmem [shape: f32[1,128], index: 2, kind: input, shape index: {}]   ;;  %s2501_s3 = inlined_call_operand.vmem [shape: f32[4,4], index: 3, kind: input, shape index: {}]   ;;  %s2502_s4 = inlined_call_operand.vmem [shape: bf16[128,64], index: 4, kind: input, shape index: {}]   ;;  %s2503_s5 = inlined_call_operand.vmem [shape: f32[1,64], index: 5, kind: input, shape index: {}]   ;;  %s2504_s6 = inlined_call_operand.vmem [shape: bf16[64,32], index: 6, kind: input, shape index: {}]   ;;  %s2505_s7 = inlined_call_operand.vmem [shape: f32[1,32], index: 7, kind: input, shape index: {}]   ;;  %s2506_s8 = inlined_call_operand.hbm [shape: f32[4,32], index: 8, kind: output, shape index: {}]  }
   0x1   :  { %v1876_v0 = vld [vmem:[%s2499_s1 + $0x40] sm:$0xff]   ;;  %v1880_v4 = vld [vmem:[%s2499_s1 + $0x48] sm:$0xff]   ;;  %v1884_v8 = vld [vmem:[%s2499_s1 + $0x50] sm:$0xff]   ;;  %v264_v36 = vunpack.c.l.s4 %v2023_v35 }
   0x2   :  { %v1877_v1 = vld [vmem:[%s2499_s1] sm:$0xff]   ;;  %1686 = vmatprep.subr.bf16.mxu0 %v1876_v0  ;;  %v1881_v5 = vld [vmem:[%s2499_s1 + $0x8] sm:$0xff]   ;;  %v1885_v9 = vld [vmem:[%s2499_s1 + $0x10] sm:$0xff]   ;;  %v267_v32 = vshrl.u32 %v266_v27, 7 }
   0x3   :  { %v1878_v2 = vld [vmem:[%s2499_s1 + $0xc0] sm:$0xff]   ;;  %1687 = vmatpush3.bf16.msra.mxu0 %v1877_v1  ;;  %v1882_v6 = vld [vmem:[%s2499_s1 + $0xc8] sm:$0xff]   ;;  %v1886_v10 = vld [vmem:[%s2499_s1 + $0xd0] sm:$0xff]   ;;  %v265_v38 = vunpack.c.0.s8 %v264_v36 }
   0x4   :  { %v1879_v3 = vld [vmem:[%s2499_s1 + $0x80] sm:$0xff]   ;;  %1708 = vmatprep.subr.bf16.mxu1 %v1878_v2  ;;  %1688 = vmatprep.subr.bf16.mxu0 %v1880_v4  ;;  %v1883_v7 = vld [vmem:[%s2499_s1 + $0x88] sm:$0xff]   ;;  %v1887_v11 = vld [vmem:[%s2499_s1 + $0x90] sm:$0xff]  }
   0x5   :  { %1709 = vmatpush3.bf16.msra.mxu1 %v1879_v3  ;;  %v1888_v12 = vld [vmem:[%s2499_s1 + $0x58] sm:$0xff]   ;;  %v1892_v16 = vld [vmem:[%s2499_s1 + $0x60] sm:$0xff]   ;;  %v1896_v20 = vld [vmem:[%s2499_s1 + $0x68] sm:$0xff]   ;;  %v2178_v41 = vsub.s32 %v265_v38, %v267_v32 }
   0x6   :  { %1710 = vmatprep.subr.bf16.mxu1 %v1882_v6  ;;  %v1889_v13 = vld [vmem:[%s2499_s1 + $0x18] sm:$0xff]   ;;  %v1893_v17 = vld [vmem:[%s2499_s1 + $0x20] sm:$0xff]   ;;  %v1897_v21 = vld [vmem:[%s2499_s1 + $0x28] sm:$0xff]  }
   0x7   :  { %1689 = vmatpush3.bf16.msra.mxu0 %v1881_v5  ;;  %v1890_v14 = vld [vmem:[%s2499_s1 + $0xd8] sm:$0xff]   ;;  %v1894_v18 = vld [vmem:[%s2499_s1 + $0xe0] sm:$0xff]   ;;  %v1898_v22 = vld [vmem:[%s2499_s1 + $0xe8] sm:$0xff]  }
   0x8   :  { %1690 = vmatprep.subr.bf16.mxu0 %v1884_v8  ;;  %v1891_v15 = vld [vmem:[%s2499_s1 + $0x98] sm:$0xff]   ;;  %v1895_v19 = vld [vmem:[%s2499_s1 + $0xa0] sm:$0xff]   ;;  %v1899_v23 = vld [vmem:[%s2499_s1 + $0xa8] sm:$0xff]  }
   0x9   :  { %1711 = vmatpush3.bf16.msra.mxu1 %v1883_v7  ;;  %v1900_v24 = vld [vmem:[%s2499_s1 + $0x70] sm:$0xff]   ;;  %v1904_v29 = vld [vmem:[%s2499_s1 + $0x78] sm:$0xff]   ;;  %v31_v33 = vld [vmem:[%s2498_s0] sm:$0xff] }
   0xa   :  { %1712 = vmatprep.subr.bf16.mxu1 %v1886_v10  ;;  %v1901_v25 = vld [vmem:[%s2499_s1 + $0x30] sm:$0xff]   ;;  %v1905_v30 = vld [vmem:[%s2499_s1 + $0x38] sm:$0xff]   ;;  %v1908_v37 = vld [vmem:[%s2499_s1 + $0x140] sm:$0xff]   ;;  %v262_v39 = vcombine.high %v31_v33, %v31_v33  ;;  %v269_v42 = vrot.slane %v31_v33, %v2178_v41 }
   0xb   :  { %1691 = vmatpush3.bf16.msra.mxu0 %v1885_v9  ;;  %v1902_v26 = vld [vmem:[%s2499_s1 + $0xf0] sm:$0xff]   ;;  %v1906_v31 = vld [vmem:[%s2499_s1 + $0xf8] sm:$0xff]   ;;  %v1911_v40 = vld [vmem:[%s2499_s1 + $0x1c0] sm:$0xff]  }
   0xc   :  { %1692 = vmatprep.subr.bf16.mxu0 %v1888_v12  ;;  %v1903_v28 = vld [vmem:[%s2499_s1 + $0xb0] sm:$0xff]   ;;  %v1907_v34 = vld [vmem:[%s2499_s1 + $0xb8] sm:$0xff]   ;;  %v276_v43 = vrot.slane %v262_v39, %v2178_v41  ;;  %v1910_v44 = vld [vmem:[%s2499_s1 + $0x100] sm:$0xff]   ;;  %v277_v46 = vcombine.high %v269_v42, %v269_v42 }
   0xd   :  { %1713 = vmatpush3.bf16.msra.mxu1 %v1887_v11  ;;  %v1912_v45 = vld [vmem:[%s2499_s1 + $0x180] sm:$0xff]   ;;  %v1913_v48 = vld [vmem:[%s2499_s1 + $0x148] sm:$0xff]   ;;  %v1917_v52 = vld [vmem:[%s2499_s1 + $0x150] sm:$0xff]  }
   0xe   :  { %1714 = vmatprep.subr.bf16.mxu1 %v1890_v14  ;;  %v278_v47 = vcombine.high %v276_v43, %v276_v43  ;;  %v1915_v49 = vld [vmem:[%s2499_s1 + $0x1c8] sm:$0xff]   ;;  %1018 = vmatprep.mubr.bf16.mxu0 %v277_v46  ;;  %v1919_v53 = vld [vmem:[%s2499_s1 + $0x1d0] sm:$0xff]   ;;  %v1921_v56 = vld [vmem:[%s2499_s1 + $0x158] sm:$0xff]  }
   0xf   :  { %1693 = vmatpush3.bf16.msra.mxu0 %v1889_v13  ;;  %v1914_v50 = vld [vmem:[%s2499_s1 + $0x108] sm:$0xff]   ;;  %v1918_v54 = vld [vmem:[%s2499_s1 + $0x110] sm:$0xff]   ;;  %v1923_v57 = vld [vmem:[%s2499_s1 + $0x1d8] sm:$0xff]  }
  0x10   :  { %1694 = vmatprep.subr.bf16.mxu0 %v1892_v16  ;;  %1058 = vmatprep.mubr.bf16.mxu1 %v278_v47  ;;  %v1916_v51 = vld [vmem:[%s2499_s1 + $0x188] sm:$0xff]   ;;  %v1920_v55 = vld [vmem:[%s2499_s1 + $0x190] sm:$0xff]   ;;  %v1922_v58 = vld [vmem:[%s2499_s1 + $0x118] sm:$0xff]  }
  0x11   :  { %1715 = vmatpush3.bf16.msra.mxu1 %v1891_v15  ;;  %v1924_v59 = vld [vmem:[%s2499_s1 + $0x198] sm:$0xff]   ;;  %v1925_v60 = vld [vmem:[%s2499_s1 + $0x160] sm:$0xff]   ;;  %v1929_v0 = vld [vmem:[%s2499_s1 + $0x168] sm:$0xff]  }
  0x12   :  { %1716 = vmatprep.subr.bf16.mxu1 %v1894_v18  ;;  %v1927_v61 = vld [vmem:[%s2499_s1 + $0x1e0] sm:$0xff]   ;;  %v1931_v1 = vld [vmem:[%s2499_s1 + $0x1e8] sm:$0xff]   ;;  %v1933_v4 = vld [vmem:[%s2499_s1 + $0x170] sm:$0xff]  }
  0x13   :  { %1695 = vmatpush3.bf16.msra.mxu0 %v1893_v17  ;;  %v1926_v62 = vld [vmem:[%s2499_s1 + $0x120] sm:$0xff]   ;;  %v1930_v2 = vld [vmem:[%s2499_s1 + $0x128] sm:$0xff]   ;;  %v1935_v5 = vld [vmem:[%s2499_s1 + $0x1f0] sm:$0xff]  }
  0x14   :  { %1696 = vmatprep.subr.bf16.mxu0 %v1896_v20  ;;  %v1928_v63 = vld [vmem:[%s2499_s1 + $0x1a0] sm:$0xff]   ;;  %v1932_v3 = vld [vmem:[%s2499_s1 + $0x1a8] sm:$0xff]   ;;  %v1934_v6 = vld [vmem:[%s2499_s1 + $0x130] sm:$0xff]  }
  0x15   :  { %1717 = vmatpush3.bf16.msra.mxu1 %v1895_v19  ;;  %v1936_v7 = vld [vmem:[%s2499_s1 + $0x1b0] sm:$0xff]   ;;  %v32_v8 = vld [vmem:[%s2498_s0 + $0x8] sm:$0xff]  ;;  %v1937_v9 = vld [vmem:[%s2499_s1 + $0x178] sm:$0xff]  }
  0x16   :  { %1718 = vmatprep.subr.bf16.mxu1 %v1898_v22  ;;  %v286_v10 = vrot.slane %v32_v8, %v2178_v41  ;;  %v279_v11 = vcombine.high %v32_v8, %v32_v8  ;;  %v1939_v12 = vld [vmem:[%s2499_s1 + $0x1f8] sm:$0xff]   ;;  %v1941_v17 = vld [vmem:[%s2499_s1 + $0x240] sm:$0xff]   ;;  %v1946_v22 = vld [vmem:[%s2499_s1 + $0x248] sm:$0xff]  }
  0x17   :  { %1697 = vmatpush3.bf16.msra.mxu0 %v1897_v21  ;;  %v1938_v13 = vld [vmem:[%s2499_s1 + $0x138] sm:$0xff]   ;;  %v1944_v19 = vld [vmem:[%s2499_s1 + $0x2c0] sm:$0xff]   ;;  %v1952_v27 = vld [vmem:[%s2499_s1 + $0x2d0] sm:$0xff]  }
  0x18   :  { %1698 = vmatprep.subr.bf16.mxu0 %v1900_v24  ;;  %v294_v14 = vcombine.high %v286_v10, %v286_v10  ;;  %v293_v15 = vrot.slane %v279_v11, %v2178_v41  ;;  %v1940_v16 = vld [vmem:[%s2499_s1 + $0x1b8] sm:$0xff]   ;;  %v1943_v20 = vld [vmem:[%s2499_s1 + $0x200] sm:$0xff]   ;;  %v1947_v24 = vld [vmem:[%s2499_s1 + $0x208] sm:$0xff]  }
  0x19   :  { %1719 = vmatpush3.bf16.msra.mxu1 %v1899_v23  ;;  %v1945_v21 = vld [vmem:[%s2499_s1 + $0x280] sm:$0xff]   ;;  %v1948_v23 = vld [vmem:[%s2499_s1 + $0x2c8] sm:$0xff]   ;;  %v1955_v32 = vld [vmem:[%s2499_s1 + $0x218] sm:$0xff]  }
  0x1a   :  { %1720 = vmatprep.subr.bf16.mxu1 %v1902_v26  ;;  %v295_v18 = vcombine.high %v293_v15, %v293_v15  ;;  %v1950_v26 = vld [vmem:[%s2499_s1 + $0x250] sm:$0xff]   ;;  %v1957_v33 = vld [vmem:[%s2499_s1 + $0x298] sm:$0xff]   ;;  %v1960_v35 = vld [vmem:[%s2499_s1 + $0x2e0] sm:$0xff]  }
  0x1b   :  { %1699 = vmatpush3.bf16.msra.mxu0 %v1901_v25  ;;  %v1949_v25 = vld [vmem:[%s2499_s1 + $0x288] sm:$0xff]   ;;  %v1959_v36 = vld [vmem:[%s2499_s1 + $0x220] sm:$0xff]   ;;  %v1969_v46 = vld [vmem:[%s2499_s1 + $0x2b0] sm:$0xff]  }
  0x1c   :  { %1700 = vmatprep.subr.bf16.mxu0 %v1904_v29  ;;  %v1953_v29 = vld [vmem:[%s2499_s1 + $0x290] sm:$0xff]   ;;  %v1962_v38 = vld [vmem:[%s2499_s1 + $0x268] sm:$0xff]  }
  0x1d   :  { %1721 = vmatpush3.bf16.msra.mxu1 %v1903_v28  ;;  %v1951_v28 = vld [vmem:[%s2499_s1 + $0x210] sm:$0xff]   ;;  %v1964_v39 = vld [vmem:[%s2499_s1 + $0x2e8] sm:$0xff]  }
  0x1e   :  { %1722 = vmatprep.subr.bf16.mxu1 %v1906_v31  ;;  %v1956_v31 = vld [vmem:[%s2499_s1 + $0x2d8] sm:$0xff]   ;;  %v33_v47 = vld [vmem:[%s2498_s0 + $0x10] sm:$0xff] }
  0x1f   :  { %1701 = vmatpush3.bf16.msra.mxu0 %v1905_v30  ;;  %v1954_v30 = vld [vmem:[%s2499_s1 + $0x258] sm:$0xff]  }
  0x20   :  { %1730 = vmatprep.subr.bf16.mxu0 %v1908_v37  ;;  %v1961_v37 = vld [vmem:[%s2499_s1 + $0x2a0] sm:$0xff]  }
  0x21   :  { %1723 = vmatpush3.bf16.msra.mxu1 %v1907_v34  ;;  %v1958_v34 = vld [vmem:[%s2499_s1 + $0x260] sm:$0xff]  }
  0x22   :  { %1752 = vmatprep.subr.bf16.mxu1 %v1911_v40  ;;  %1019 = vmatmul.mubr.bf16.vlgmr.msra.gmra.mrb[0].mxu0 %v269_v42  ;;  %v1963_v40 = vld [vmem:[%s2499_s1 + $0x228] sm:$0xff]  }
  0x23   :  { %1731 = vmatpush3.bf16.msra.mxu0 %v1910_v44  ;;  %1098 = vmatprep.mubr.bf16.mxu0 %v294_v14  ;;  %v1965_v42 = vld [vmem:[%s2499_s1 + $0x2a8] sm:$0xff]   ;;  %v1968_v44 = vld [vmem:[%s2499_s1 + $0x2f0] sm:$0xff]  }
  0x24   :  { %1059 = vmatmul.mubr.bf16.vlgmr.msra.gmra.mrb[0].mxu1 %v276_v43  ;;  %1732 = vmatprep.subr.bf16.mxu0 %v1913_v48  ;;  %v1966_v43 = vld [vmem:[%s2499_s1 + $0x270] sm:$0xff]   ;;  %v1970_v48 = vld [vmem:[%s2499_s1 + $0x278] sm:$0xff]  }
  0x25   :  { %1753 = vmatpush3.bf16.msra.mxu1 %v1912_v45  ;;  %1138 = vmatprep.mubr.bf16.mxu1 %v295_v18  ;;  %v1967_v45 = vld [vmem:[%s2499_s1 + $0x230] sm:$0xff]  }
  0x26   :  { %1754 = vmatprep.subr.bf16.mxu1 %v1915_v49  ;;  %v303_v49 = vrot.slane %v33_v47, %v2178_v41 }
  0x27   :  { %1733 = vmatpush3.bf16.msra.mxu0 %v1914_v50  ;;  %v296_v50 = vcombine.high %v33_v47, %v33_v47 }
  0x28   :  { %1734 = vmatprep.subr.bf16.mxu0 %v1917_v52  ;;  %v311_v52 = vcombine.high %v303_v49, %v303_v49 }
  0x29   :  { %1755 = vmatpush3.bf16.msra.mxu1 %v1916_v51  ;;  %v1972_v51 = vld [vmem:[%s2499_s1 + $0x2f8] sm:$0xff]  }
  0x2a   :  { %1756 = vmatprep.subr.bf16.mxu1 %v1919_v53  ;;  %v310_v53 = vrot.slane %v296_v50, %v2178_v41  ;;  %v1975_v41 = vld [vmem:[%s2499_s1 + $0x300] sm:$0xff]  }
  0x2b   :  { %1735 = vmatpush3.bf16.msra.mxu0 %v1918_v54  ;;  %v1971_v54 = vld [vmem:[%s2499_s1 + $0x238] sm:$0xff]  }
  0x2c   :  { %1736 = vmatprep.subr.bf16.mxu0 %v1921_v56  ;;  %v312_v56 = vcombine.high %v310_v53, %v310_v53 }
  0x2d   :  { %1757 = vmatpush3.bf16.msra.mxu1 %v1920_v55  ;;  %v1973_v55 = vld [vmem:[%s2499_s1 + $0x2b8] sm:$0xff]  }
  0x2e   :  { %1758 = vmatprep.subr.bf16.mxu1 %v1923_v57  ;;  %v2024_v57 = vmov 0  }
  0x2f   :  { %1737 = vmatpush3.bf16.msra.mxu0 %v1922_v58  ;;  %v1976_v58 = vld [vmem:[%s2499_s1 + $0x308] sm:$0xff]  }
  0x30   :  { %1738 = vmatprep.subr.bf16.mxu0 %v1925_v60  ;;  %v1977_v60 = vld [vmem:[%s2499_s1 + $0x310] sm:$0xff]  }
  0x31   :  { %1759 = vmatpush3.bf16.msra.mxu1 %v1924_v59  ;;  %v1559_v59 = vld.sshfl [vmem:[%s2498_s0 + $0x18] sm:$0x33 pattern:$0x76325410] }
  0x32   :  { %1760 = vmatprep.subr.bf16.mxu1 %v1927_v61  ;;  %v320_v61 = vcombine.high %v1559_v59, %v1559_v59 }
  0x33   :  { %1739 = vmatpush3.bf16.msra.mxu0 %v1926_v62  ;;  %v1978_v62 = vld [vmem:[%s2499_s1 + $0x318] sm:$0xff]  }
  0x34   :  { %1740 = vmatprep.subr.bf16.mxu0 %v1929_v0 }
  0x35   :  { %1761 = vmatpush3.bf16.msra.mxu1 %v1928_v63 }
  0x36   :  { %1762 = vmatprep.subr.bf16.mxu1 %v1931_v1 }
  0x37   :  { %1741 = vmatpush3.bf16.msra.mxu0 %v1930_v2 }
  0x38   :  { %1742 = vmatprep.subr.bf16.mxu0 %v1933_v4 }
  0x39   :  { %1763 = vmatpush3.bf16.msra.mxu1 %v1932_v3 }
  0x3a   :  { %1764 = vmatprep.subr.bf16.mxu1 %v1935_v5 }
  0x3b   :  { %1743 = vmatpush3.bf16.msra.mxu0 %v1934_v6 }
  0x3c   :  { %1744 = vmatprep.subr.bf16.mxu0 %v1937_v9 }
  0x3d   :  { %1765 = vmatpush3.bf16.msra.mxu1 %v1936_v7 }
  0x3e   :  { %1766 = vmatprep.subr.bf16.mxu1 %v1939_v12 }
  0x3f   :  { %1745 = vmatpush3.bf16.msra.mxu0 %v1938_v13 }
  0x40   :  { %1774 = vmatprep.subr.bf16.mxu0 %v1941_v17 }
  0x41   :  { %1767 = vmatpush3.bf16.msra.mxu1 %v1940_v16 }
  0x42   :  { %1796 = vmatprep.subr.bf16.mxu1 %v1944_v19  ;;  %1099 = vmatmul.mubr.bf16.vlgmr.msra.gmra.mrb[4].mxu0 %v286_v10 }
  0x43   :  { %1775 = vmatpush3.bf16.msra.mxu0 %v1943_v20  ;;  %1178 = vmatprep.mubr.bf16.mxu0 %v311_v52 }
  0x44   :  { %1139 = vmatmul.mubr.bf16.vlgmr.msra.gmra.mrb[4].mxu1 %v293_v15  ;;  %1776 = vmatprep.subr.bf16.mxu0 %v1946_v22 }
  0x45   :  { %1797 = vmatpush3.bf16.msra.mxu1 %v1945_v21  ;;  %1218 = vmatprep.mubr.bf16.mxu1 %v312_v56 }
  0x46   :  { %1798 = vmatprep.subr.bf16.mxu1 %v1948_v23 }
  0x47   :  { %1777 = vmatpush3.bf16.msra.mxu0 %v1947_v24 }
  0x48   :  { %1778 = vmatprep.subr.bf16.mxu0 %v1950_v26 }
  0x49   :  { %1799 = vmatpush3.bf16.msra.mxu1 %v1949_v25 }
  0x4a   :  { %1800 = vmatprep.subr.bf16.mxu1 %v1952_v27 }
  0x4b   :  { %1779 = vmatpush3.bf16.msra.mxu0 %v1951_v28 }
  0x4c   :  { %1780 = vmatprep.subr.bf16.mxu0 %v1954_v30 }
  0x4d   :  { %1801 = vmatpush3.bf16.msra.mxu1 %v1953_v29 }
  0x4e   :  { %1802 = vmatprep.subr.bf16.mxu1 %v1956_v31 }
  0x4f   :  { %1781 = vmatpush3.bf16.msra.mxu0 %v1955_v32 }
  0x50   :  { %1782 = vmatprep.subr.bf16.mxu0 %v1958_v34 }
  0x51   :  { %1803 = vmatpush3.bf16.msra.mxu1 %v1957_v33 }
  0x52   :  { %1804 = vmatprep.subr.bf16.mxu1 %v1960_v35 }
  0x53   :  { %1783 = vmatpush3.bf16.msra.mxu0 %v1959_v36 }
  0x54   :  { %1784 = vmatprep.subr.bf16.mxu0 %v1962_v38 }
  0x55   :  { %1805 = vmatpush3.bf16.msra.mxu1 %v1961_v37 }
  0x56   :  { %1806 = vmatprep.subr.bf16.mxu1 %v1964_v39 }
  0x57   :  { %1785 = vmatpush3.bf16.msra.mxu0 %v1963_v40 }
  0x58   :  { %1786 = vmatprep.subr.bf16.mxu0 %v1966_v43 }
  0x59   :  { %1807 = vmatpush3.bf16.msra.mxu1 %v1965_v42 }
  0x5a   :  { %1808 = vmatprep.subr.bf16.mxu1 %v1968_v44 }
  0x5b   :  { %1787 = vmatpush3.bf16.msra.mxu0 %v1967_v45 }
  0x5c   :  { %1788 = vmatprep.subr.bf16.mxu0 %v1970_v48 }
  0x5d   :  { %1809 = vmatpush3.bf16.msra.mxu1 %v1969_v46 }
  0x5e   :  { %1810 = vmatprep.subr.bf16.mxu1 %v1972_v51 }
  0x5f   :  { %1789 = vmatpush3.bf16.msra.mxu0 %v1971_v54 }
  0x60   :  { %1226 = vmatprep.subr.bf16.mxu0 %v2024_v57 }
  0x61   :  { %1811 = vmatpush3.bf16.msra.mxu1 %v1973_v55 }
  0x62   :  { %1179 = vmatmul.mubr.bf16.vlgmr.msra.gmra.mrb[8].mxu0 %v303_v49 }
  0x63   :  { %1227 = vmatpush1.bf16.msra.mxu0 %v1975_v41  ;;  %1668 = vmatprep.mubr.msk.bf16.mxu0 %vm982_vm0, %v320_v61 }
  0x64   :  { %1219 = vmatmul.mubr.bf16.vlgmr.msra.gmra.mrb[8].mxu1 %v310_v53  ;;  %1228 = vmatprep.subr.bf16.mxu0 %v2024_v57 }
  0x67   :  { %1229 = vmatpush1.bf16.msra.mxu0 %v1976_v58 }
  0x68   :  { %1230 = vmatprep.subr.bf16.mxu0 %v2024_v57 }
  0x6b   :  { %1231 = vmatpush1.bf16.msra.mxu0 %v1977_v60 }
  0x6c   :  { %1232 = vmatprep.subr.bf16.mxu0 %v2024_v57 }
  0x6d   :  { %13 = vsyncpa [#allocation3], 0  ;;  %v1979_v63 = vld [vmem:[%s2499_s1 + $0x320] sm:$0xff]   ;;  %v1980_v0 = vld [vmem:[%s2499_s1 + $0x328] sm:$0xff]   ;;  %v2025_v7 = vmov 0.0   ;;  %vm2026_vm1 = vmmov 0  }
  0x6e   :  { %v1981_v1 = vld [vmem:[%s2499_s1 + $0x330] sm:$0xff]   ;;  %v1982_v2 = vld [vmem:[%s2499_s1 + $0x338] sm:$0xff]   ;;  %v1983_v3 = vld [vmem:[%s2499_s1 + $0x340] sm:$0xff]   ;;  %1839 = vmatprep.subr.bf16.mxu1 %v2025_v7  ;;  %1855 = vmatprep.mubr.msk.bf16.mxu1 %vm2026_vm1, %v2025_v7  ;;  %vm1272_vm2 = vcmask 1043456   ;;  %vm1268_vm3 = vcmask 31744   ;;  %s2027_s12 = smov [#allocation2]  }
  0x6f   :  { %1233 = vmatpush1.bf16.msra.mxu0 %v1978_v62  ;;  %v1984_v4 = vld [vmem:[%s2499_s1 + $0x348] sm:$0xff]   ;;  %v1985_v5 = vld [vmem:[%s2499_s1 + $0x350] sm:$0xff]   ;;  %v1986_v6 = vld [vmem:[%s2499_s1 + $0x358] sm:$0xff]   ;;  %vm1542_vm4 = vcmask 257024  }
  0x70   :  { %1234 = vmatprep.subr.bf16.mxu0 %v2024_v57  ;;  %v1987_v8 = vld [vmem:[%s2502_s4] sm:$0xff]   ;;  %v1988_v9 = vld [vmem:[%s2502_s4 + $0x8] sm:$0xff]   ;;  %v1989_v10 = vld [vmem:[%s2502_s4 + $0x10] sm:$0xff]  }
  0x71   :  { %1840 = vmatpush3.bf16.msra.mxu1 %v1987_v8  ;;  %v1990_v13 = vld [vmem:[%s2502_s4 + $0x18] sm:$0xff]   ;;  %v1558_v14 = vld [vmem:[%s2500_s2] ss:$0 sm:$0xff]  ;;  %v1992_v26 = vld [vmem:[%s2502_s4 + $0x28] sm:$0xff]  }
  0x72   :  { %1841 = vmatprep.subr.bf16.mxu1 %v2025_v7  ;;  %v1991_v24 = vld [vmem:[%s2502_s4 + $0x20] sm:$0xff]   ;;  %v1993_v27 = vld [vmem:[%s2502_s4 + $0x30] sm:$0xff]  }
  0x73   :  { %1235 = vmatpush1.bf16.msra.mxu0 %v1979_v63  ;;  %v1267_v58 = vld [vmem:[%s2501_s3] sm:$0xf] }
  0x74   :  { %1236 = vmatprep.subr.bf16.mxu0 %v2024_v57  ;;  %v1995_v61 = vld [vmem:[%s2504_s6] sm:$0xff]  }
  0x75   :  { %1842 = vmatpush3.bf16.msra.mxu1 %v1988_v9 }
  0x76   :  { %1843 = vmatprep.subr.bf16.mxu1 %v2025_v7 }
  0x77   :  { %1237 = vmatpush1.bf16.msra.mxu0 %v1980_v0  ;;  %v1996_v0 = vld [vmem:[%s2504_s6 + $0x8] sm:$0xff]  }
  0x78   :  { %1238 = vmatprep.subr.bf16.mxu0 %v2024_v57 }
  0x79   :  { %1844 = vmatpush3.bf16.msra.mxu1 %v1989_v10 }
  0x7a   :  { %1845 = vmatprep.subr.bf16.mxu1 %v2025_v7 }
  0x7b   :  { %1239 = vmatpush1.bf16.msra.mxu0 %v1981_v1  ;;  %v1997_v1 = vld [vmem:[%s2504_s6 + $0x10] sm:$0xff]  }
  0x7c   :  { %1240 = vmatprep.subr.bf16.mxu0 %v2024_v57 }
  0x7d   :  { %1846 = vmatpush3.bf16.msra.mxu1 %v1990_v13 }
  0x7e   :  { %1847 = vmatprep.subr.bf16.mxu1 %v2025_v7 }
  0x7f   :  { %1241 = vmatpush1.bf16.msra.mxu0 %v1982_v2  ;;  %v1998_v2 = vld [vmem:[%s2504_s6 + $0x18] sm:$0xff]   ;;  %s1550_s6 = sshll.u32 %s2027_s12, 4  ;;  %s1551_s6 = int_to_ptr.vmem [resolvable:$true] %s1550_s6 }
  0x80   :  { %1242 = vmatprep.subr.bf16.mxu0 %v2024_v57  ;;  %p2004_p1 = scmp.lt.s32.totalorder %s1551_s6, %s1551_s6 }
  0x81   :  { %1848 = vmatpush3.bf16.msra.mxu1 %v1991_v24 }
  0x82   :  { %1849 = vmatprep.subr.bf16.mxu1 %v2025_v7 }
  0x83   :  { %1243 = vmatpush1.bf16.msra.mxu0 %v1983_v3  ;;  %v1671_v3 = vld [vmem:[%s2503_s5] ss:$0 sm:$0xff]  ;;  %s1999_s5 = scalar_lea.vmem %s1551_s6, 64 }
  0x84   :  { %1244 = vmatprep.subr.bf16.mxu0 %v2024_v57  ;;  %p2000_p0 = scmp.ne.s32.totalorder %s1551_s6, %s1999_s5  ;;  %p2005_p2 = scmp.lt.s32.totalorder %s1999_s5, %s1999_s5 }
  0x85   :  { %1850 = vmatpush3.bf16.msra.mxu1 %v1992_v26 }
  0x86   :  { %1851 = vmatprep.subr.bf16.mxu1 %v2025_v7  ;;  %p2006_p3 = por %p2005_p2, %p2004_p1 }
  0x87   :  { %1245 = vmatpush1.bf16.msra.mxu0 %v1984_v4 }
  0x88   :  { %1246 = vmatprep.subr.bf16.mxu0 %v2024_v57  ;;  %p2007_p4 = pnand %p2006_p3, %p2000_p0 }
  0x89   :  { %1852 = vmatpush3.bf16.msra.mxu1 %v1993_v27 }
  0x8a   :  { %1853 = vmatprep.subr.bf16.mxu1 %v2025_v7 }
  0x8b   :  { %1247 = vmatpush1.bf16.msra.mxu0 %v1985_v5 }
  0x8c   :  { %1248 = vmatprep.subr.bf16.mxu0 %v2024_v57 }
  0x8f   :  { %1249 = vmatpush1.bf16.msra.mxu0 %v1986_v6 }
  0x90   :  { %1834 = vmatprep.subr.mxu0 %v2025_v7 }
  0x92   :  { %1259 = vmatmul.mubr.bf16.vlgmr.msra.gmra.mrb[12].mxu0 %v1559_v59  ;;  %v1994_v59 = vld [vmem:[%s2502_s4 + $0x38] sm:$0xff]  }
  0x93   :  { %1836 = vmatprep.mubr.msk.f32.mxu0 %vm2026_vm1, %v2025_v7  ;;  %1854 = vmatpush3.bf16.msra.mxu1 %v1994_v59 }
  0x94   :  { %1859 = vmatprep.subr.bf16.mxu1 %v2025_v7 }
  0xf5   :  { %v1702_v11 = vpop.f32.mrb[0].mxu0 }
  0xf6   :  { %v1703_v15 = vpop.f32.mrb[1].mxu0 }
  0xf7   :  { %v1724_v12 = vpop.f32.mrb[0].mxu1  ;;  %v1704_v17 = vadd.f32 %v1703_v15, %v1702_v11  ;;  %v1705_v18 = vpop.f32.mrb[2].mxu0 }
  0xf8   :  { %v1725_v16 = vpop.f32.mrb[1].mxu1  ;;  %v1706_v21 = vpop.f32.mrb[3].mxu0 }
  0xf9   :  { %v1726_v19 = vadd.f32 %v1725_v16, %v1724_v12  ;;  %v1727_v20 = vpop.f32.mrb[2].mxu1  ;;  %v1021_v23 = vadd.f32 %v1704_v17, %v1558_v14 }
  0xfa   :  { %v1728_v22 = vpop.f32.mrb[3].mxu1 }
  0xfb   :  { %v1061_v25 = vadd.f32 %v1726_v19, %v1021_v23 }
 0x115   :  { %v1746_v28 = vpop.f32.mrb[4].mxu0 }
 0x116   :  { %v1747_v30 = vpop.f32.mrb[5].mxu0 }
 0x117   :  { %v1768_v29 = vpop.f32.mrb[4].mxu1  ;;  %v1748_v32 = vadd.f32 %v1747_v30, %v1746_v28  ;;  %v1749_v33 = vpop.f32.mrb[6].mxu0 }
 0x118   :  { %v1769_v31 = vpop.f32.mrb[5].mxu1  ;;  %v1750_v36 = vpop.f32.mrb[7].mxu0 }
 0x119   :  { %v1770_v34 = vadd.f32 %v1769_v31, %v1768_v29  ;;  %v1771_v35 = vpop.f32.mrb[6].mxu1  ;;  %v1101_v38 = vadd.f32 %v1748_v32, %v1061_v25 }
 0x11a   :  { %v1772_v37 = vpop.f32.mrb[7].mxu1 }
 0x11b   :  { %v1141_v39 = vadd.f32 %v1770_v34, %v1101_v38 }
 0x135   :  { %v1790_v40 = vpop.f32.mrb[8].mxu0 }
 0x136   :  { %v1791_v43 = vpop.f32.mrb[9].mxu0 }
 0x137   :  { %v1812_v42 = vpop.f32.mrb[8].mxu1  ;;  %v1792_v45 = vadd.f32 %v1791_v43, %v1790_v40  ;;  %v1793_v46 = vpop.f32.mrb[10].mxu0 }
 0x138   :  { %v1813_v44 = vpop.f32.mrb[9].mxu1  ;;  %v1794_v49 = vpop.f32.mrb[11].mxu0 }
 0x139   :  { %v1814_v47 = vadd.f32 %v1813_v44, %v1812_v42  ;;  %v1815_v48 = vpop.f32.mrb[10].mxu1  ;;  %v1181_v51 = vadd.f32 %v1792_v45, %v1141_v39 }
 0x13a   :  { %v1816_v50 = vpop.f32.mrb[11].mxu1 }
 0x13b   :  { %v1221_v52 = vadd.f32 %v1814_v47, %v1181_v51 }
 0x165   :  { %v1260_v53 = vpop.f32.mrb[12].mxu0 }
 0x166   :  { %v1261_v54 = vadd.f32 %v1260_v53, %v1221_v52  ;;  %v1262_v55 = vpop.f32.mrb[13].mxu0 }
 0x167   :  { %v1263_v56 = vpop.f32.mrb[14].mxu0 }
 0x168   :  { %v1266_v41 = vmax.f32 %v1261_v54, 0.0  ;;  %v1264_v57 = vpop.f32.mrb[15].mxu0 }
 0x16a   :  { %1835 = vmatpush3.msk.msra.mxu0 %vm1272_vm2, %v1266_v41 }
 0x16b   :  { %1837 = vmatmul.mubr.msk.f32.vlgmr.msra.gmra.mrb[16].mxu0 %vm1268_vm3, %v1267_v58 }
 0x23e   :  { %v1342_v60 = vpop.f32.mrb[16].mxu0 }
 0x23f   :  { %v1346_v62 = vpack.c.bf16 %v1342_v60, %v1342_v60  ;;  %v1838_v63 = vpop.f32.mrb[17].mxu0 }
 0x241   :  { %1856 = vmatmul.mubr.bf16.vlgmr.msra.gmra.mrb[12].mxu1 %v1346_v62 }
 0x242   :  { %1860 = vmatpush3.bf16.msra.mxu1 %v1995_v61  ;;  %1867 = vmatprep.mubr.msk.bf16.mxu1 %vm2026_vm1, %v2025_v7 }
 0x243   :  { %1861 = vmatprep.subr.bf16.mxu1 %v2025_v7 }
 0x246   :  { %1862 = vmatpush3.bf16.msra.mxu1 %v1996_v0 }
 0x247   :  { %1863 = vmatprep.subr.bf16.mxu1 %v2025_v7 }
 0x24a   :  { %1864 = vmatpush3.bf16.msra.mxu1 %v1997_v1 }
 0x24b   :  { %1865 = vmatprep.subr.bf16.mxu1 %v2025_v7  ;;  %v1680_v7 = vld [vmem:[%s2505_s7] ss:$0 sm:$0xff] }
 0x24e   :  { %1866 = vmatpush3.bf16.msra.mxu1 %v1998_v2 }
 0x314   :  { %v1452_v4 = vpop.f32.mrb[12].mxu1 }
 0x315   :  { %v1453_v5 = vadd.f32 %v1671_v3, %v1452_v4  ;;  %v1857_v6 = vpop.f32.mrb[13].mxu1 }
 0x316   :  { %v1455_v8 = vpop.f32.mrb[14].mxu1 }
 0x317   :  { %v1458_v9 = vmax.f32 %v1453_v5, 0.0  ;;  %v1858_v10 = vpop.f32.mrb[15].mxu1 }
 0x319   :  { %v1459_v11 = vpack.c.bf16 %v1458_v9, %v1458_v9 }
 0x31b   :  { %1868 = vmatmul.mubr.msk.bf16.vlgmr.msra.gmra.mrb[16].mxu1 %vm982_vm0, %v1459_v11 }
 0x3ee   :  { %v1536_v12 = vpop.f32.mrb[16].mxu1 }
 0x3ef   :  { %v1537_v13 = vadd.f32 %v1680_v7, %v1536_v12  ;;  %v1869_v14 = vpop.f32.mrb[17].mxu1 }
 0x3f0   :  { %v1539_v15 = vpop.f32.mrb[18].mxu1 }
 0x3f1   :  { %v1870_v16 = vpop.f32.mrb[19].mxu1  ;;  %1543 = vst.msk [vmem:[#allocation2] sm:$0xf] %vm1542_vm4, %v1537_v13 }
 0x3f2   :  { %2010 = shalt.err (!%p2007_p4)
}
 0x3f3   :  { %s2011_s7 = scalar_lea.hbm %s2506_s8, 64 }
 0x3f4   :  { %p2012_p5 = scmp.ne.s32.totalorder %s2506_s8, %s2011_s7  ;;  %p2015_p6 = scmp.lt.u32.totalorder %s2011_s7, %s2506_s8 }
 0x3f6   :  { %p2017_p7 = pnand %p2015_p6, %p2012_p5 }
 0x3f8   :  { %2020 = shalt.err (!%p2017_p7)
}
 0x3f9   :  { %1553 = dma.vmem_to_hbm [thread:$0]  %s1551_s6, 64, %s2506_s8, [#allocation3]  }
 0x3fa   :  { %2021 = dma.done.wait [#allocation3], 64  }
 0x3fb   :  { %2022 = vsyncadd [#allocation3], 4294967232 }
 0x3fc   :  { %1557 = vsyncpa [#allocation3], 1 }

</bundles_post_ra>
